<compile_context>
chip_gen: v6e
topology: v6e:2x2x1
jax: 0.10.0
libtpu: 0.0.40
codegen_flags: <defaults>
</compile_context>

<pallas_src>
import jax
import jax.numpy as jnp
from jax.experimental import pallas as pl
from jax.experimental.pallas import tpu as pltpu


IN_DIM = 28 * 28   # 784
HID = 512
OUT_DIM = 10
OUT_PAD = 128      # lane-dense padded output width
TB_MAX = 512       # max batch rows per grid step


def _round_up(x, m):
    return ((x + m - 1) // m) * m


def mlp_kernel(x_ref, w1_ref, b1_ref, w2_ref, b2_ref, w3_ref, b3_ref, o_ref):
    # In-kernel cast: x tile arrives as f32 (half the HBM traffic of the old
    # wrapper-side bf16 round trip); cast to bf16 only as the MXU operand.
    x = x_ref[...].astype(jnp.bfloat16)
    # Layer 1: (TB, 784)bf16 @ (784, 512)bf16 -> f32 acc, +bias, ReLU
    h1 = jnp.dot(x, w1_ref[...], preferred_element_type=jnp.float32)
    h1 = jnp.maximum(h1 + b1_ref[...], 0.0).astype(jnp.bfloat16)
    # Layer 2: (TB, 512) @ (512, 512)
    h2 = jnp.dot(h1, w2_ref[...], preferred_element_type=jnp.float32)
    h2 = jnp.maximum(h2 + b2_ref[...], 0.0).astype(jnp.bfloat16)
    # Layer 3: (TB, 512) @ (512, 128) -> padded logits (only first 10 cols real)
    logits = jnp.dot(h2, w3_ref[...], preferred_element_type=jnp.float32)
    o_ref[...] = (logits + b3_ref[...]).astype(o_ref.dtype)


def _pick_batch_tiling(B):
    """Pick (TB, B_pad, n_tiles): large tiles, >=2 grid steps when possible,
    minimal padding waste for awkward batch sizes."""
    n_tiles = max(1, pl.cdiv(B, TB_MAX))
    if B >= 32:
        # Ensure the batch axis has at least 2 grid steps so the "parallel"
        # dimension can shard across the 2 TensorCores on v7x.
        n_tiles = max(n_tiles, 2)
    TB = _round_up(pl.cdiv(B, n_tiles), 16)
    n_tiles = pl.cdiv(B, TB)
    B_pad = n_tiles * TB
    return TB, B_pad, n_tiles


def yijin_forward(x_nchw, params):
    """x_nchw: (B, 1, 28, 28) float32. Returns logits (B, 10) float32."""
    w1, b1, w2, b2, w3, b3 = params
    B = x_nchw.shape[0]

    # torch.nn.Flatten: flatten all dims except batch (free reshape of
    # contiguous NCHW); keep f32 — the bf16 cast happens inside the kernel.
    x = x_nchw.reshape(B, -1)

    TB, B_pad, n_tiles = _pick_batch_tiling(B)
    if B_pad != B:
        x = jnp.pad(x, ((0, B_pad - B), (0, 0)))

    # Pad the last layer to 128 output lanes (dense stores, clean MXU N dim).
    w3p = jnp.pad(w3, ((0, 0), (0, OUT_PAD - OUT_DIM)))
    b3p = jnp.pad(b3, ((0, 0), (0, OUT_PAD - OUT_DIM)))

    grid = (n_tiles,)

    # Resident (non-tiled) specs for weights/biases: same block every step.
    resident = lambda shape: pl.BlockSpec(shape, lambda i: (0, 0))

    flops = 2 * B_pad * (IN_DIM * HID + HID * HID + HID * OUT_PAD)
    bytes_accessed = (
        x.size * 4                                   # f32 input (cast in-kernel)
        + (w1.size + w2.size + w3p.size) * 2         # bf16 weights
        + (b1.size + b2.size + b3p.size) * 4         # f32 biases
        + B_pad * OUT_PAD * 4                        # f32 output
    )

    out = pl.pallas_call(
        mlp_kernel,
        out_shape=jax.ShapeDtypeStruct((B_pad, OUT_PAD), jnp.float32),
        grid=grid,
        in_specs=[
            pl.BlockSpec((TB, IN_DIM), lambda i: (i, 0)),     # x tile, pipelined
            resident((IN_DIM, HID)), resident((1, HID)),       # layer 1
            resident((HID, HID)),    resident((1, HID)),       # layer 2
            resident((HID, OUT_PAD)), resident((1, OUT_PAD)),  # layer 3 (padded)
        ],
        out_specs=pl.BlockSpec((TB, OUT_PAD), lambda i: (i, 0)),
        compiler_params=pltpu.CompilerParams(
            dimension_semantics=("parallel",),   # megacore sharding on v7x
            vmem_limit_bytes=32 << 20,
        ),
        cost_estimate=pl.CostEstimate(
            flops=flops, transcendentals=0, bytes_accessed=bytes_accessed),
    )(x, w1, b1, w2, b2, w3p, b3p)

    return out[:B, :OUT_DIM]


def init_params(key):
    """Deterministic init mimicking nn.Linear defaults:
    U(-1/sqrt(fan_in), 1/sqrt(fan_in)) for weight and bias.
    Weights stored as (in, out) bf16; biases as (1, out) f32."""
    def linear(key, fan_in, fan_out):
        kw, kb = jax.random.split(key)
        bound = 1.0 / jnp.sqrt(fan_in)
        w = jax.random.uniform(kw, (fan_in, fan_out), jnp.float32, -bound, bound)
        b = jax.random.uniform(kb, (1, fan_out), jnp.float32, -bound, bound)
        return w.astype(jnp.bfloat16), b

    k1, k2, k3 = jax.random.split(key, 3)
    w1, b1 = linear(k1, IN_DIM, HID)
    w2, b2 = linear(k2, HID, HID)
    w3, b3 = linear(k3, HID, OUT_DIM)
    return (w1, b1, w2, b2, w3, b3)


def reference_forward(x_nchw, params):
    """Pure-JAX reference mirroring the kernel's numerics
    (bf16 operands, f32 accumulation)."""
    w1, b1, w2, b2, w3, b3 = params
    x = x_nchw.reshape(x_nchw.shape[0], -1).astype(jnp.bfloat16)
    h1 = jnp.maximum(
        jnp.dot(x, w1, preferred_element_type=jnp.float32) + b1, 0.0
    ).astype(jnp.bfloat16)
    h2 = jnp.maximum(
        jnp.dot(h1, w2, preferred_element_type=jnp.float32) + b2, 0.0
    ).astype(jnp.bfloat16)
    return jnp.dot(h2, w3, preferred_element_type=jnp.float32) + b3


if __name__ == "__main__":
    key = jax.random.PRNGKey(0)
    kx, kp = jax.random.split(key)

    B = 8
    x = jax.random.normal(kx, (B, 1, 28, 28), jnp.float32)  # MNIST-like NCHW
    params = init_params(kp)

    fwd = jax.jit(yijin_forward)
    logits = jax.block_until_ready(fwd(x, params))

    ref = reference_forward(x, params)
    assert logits.shape == (B, OUT_DIM)
    assert jnp.allclose(logits, ref, atol=1e-2, rtol=1e-2), "mismatch vs reference"

    print("KERNEL_OK")
</pallas_src>

<mosaic_0001>
module attributes {stable_mosaic.version = 11 : i64} {
  func.func @mlp_kernel(%arg0: i32, %arg1: memref<16x784xf32, #tpu.memory_space<vmem>>, %arg2: memref<784x512xbf16, #tpu.memory_space<vmem>>, %arg3: memref<1x512xf32, #tpu.memory_space<vmem>>, %arg4: memref<512x512xbf16, #tpu.memory_space<vmem>>, %arg5: memref<1x512xf32, #tpu.memory_space<vmem>>, %arg6: memref<512x128xbf16, #tpu.memory_space<vmem>>, %arg7: memref<1x128xf32, #tpu.memory_space<vmem>>, %arg8: memref<16x128xf32, #tpu.memory_space<vmem>>) attributes {dimension_semantics = [#tpu.dimension_semantics<parallel>], iteration_bounds = array<i64: 1>, scalar_prefetch = 0 : i64, scratch_operands = 0 : i64, tpu.core_type = #tpu.core_type<tc>, window_params = [{transform_indices = @transform_0, window_bounds = array<i64: 16, 784>}, {pipeline_mode = #tpu.pipeline_mode<synchronous>, transform_indices = @transform_1, window_bounds = array<i64: 784, 512>}, {pipeline_mode = #tpu.pipeline_mode<synchronous>, transform_indices = @transform_2, window_bounds = array<i64: 1, 512>}, {pipeline_mode = #tpu.pipeline_mode<synchronous>, transform_indices = @transform_3, window_bounds = array<i64: 512, 512>}, {pipeline_mode = #tpu.pipeline_mode<synchronous>, transform_indices = @transform_4, window_bounds = array<i64: 1, 512>}, {pipeline_mode = #tpu.pipeline_mode<synchronous>, transform_indices = @transform_5, window_bounds = array<i64: 512, 128>}, {pipeline_mode = #tpu.pipeline_mode<synchronous>, transform_indices = @transform_6, window_bounds = array<i64: 1, 128>}, {transform_indices = @transform_7, window_bounds = array<i64: 16, 128>}]} {
    %c0 = arith.constant 0 : index
    %c0_0 = arith.constant 0 : index
    %0 = vector.load %arg1[%c0, %c0_0] : memref<16x784xf32, #tpu.memory_space<vmem>>, vector<16x784xf32>
    %1 = arith.truncf %0 : vector<16x784xf32> to vector<16x784xbf16>
    %c0_1 = arith.constant 0 : index
    %c0_2 = arith.constant 0 : index
    %2 = vector.load %arg2[%c0_1, %c0_2] : memref<784x512xbf16, #tpu.memory_space<vmem>>, vector<784x512xbf16>
    %cst = arith.constant dense<0.000000e+00> : vector<16x512xf32>
    %3 = tpu.matmul %1, %2, %cst {dimension_numbers = #tpu.dot_dimension_numbers<[1], [0], [0], [1], [0, 0, 1, 1], [], []>} : vector<16x784xbf16>, vector<784x512xbf16>, vector<16x512xf32> -> vector<16x512xf32>
    %c0_3 = arith.constant 0 : index
    %c0_4 = arith.constant 0 : index
    %4 = vector.load %arg3[%c0_3, %c0_4] : memref<1x512xf32, #tpu.memory_space<vmem>>, vector<1x512xf32>
    %5 = vector.broadcast %4 : vector<1x512xf32> to vector<16x512xf32>
    %6 = arith.addf %3, %5 : vector<16x512xf32>
    %cst_5 = arith.constant 0.000000e+00 : f32
    %7 = vector.broadcast %cst_5 : f32 to vector<16x512xf32>
    %8 = arith.maximumf %6, %7 : vector<16x512xf32>
    %9 = arith.truncf %8 : vector<16x512xf32> to vector<16x512xbf16>
    %c0_6 = arith.constant 0 : index
    %c0_7 = arith.constant 0 : index
    %10 = vector.load %arg4[%c0_6, %c0_7] : memref<512x512xbf16, #tpu.memory_space<vmem>>, vector<512x512xbf16>
    %cst_8 = arith.constant dense<0.000000e+00> : vector<16x512xf32>
    %11 = tpu.matmul %9, %10, %cst_8 {dimension_numbers = #tpu.dot_dimension_numbers<[1], [0], [0], [1], [0, 0, 1, 1], [], []>} : vector<16x512xbf16>, vector<512x512xbf16>, vector<16x512xf32> -> vector<16x512xf32>
    %c0_9 = arith.constant 0 : index
    %c0_10 = arith.constant 0 : index
    %12 = vector.load %arg5[%c0_9, %c0_10] : memref<1x512xf32, #tpu.memory_space<vmem>>, vector<1x512xf32>
    %13 = vector.broadcast %12 : vector<1x512xf32> to vector<16x512xf32>
    %14 = arith.addf %11, %13 : vector<16x512xf32>
    %cst_11 = arith.constant 0.000000e+00 : f32
    %15 = vector.broadcast %cst_11 : f32 to vector<16x512xf32>
    %16 = arith.maximumf %14, %15 : vector<16x512xf32>
    %17 = arith.truncf %16 : vector<16x512xf32> to vector<16x512xbf16>
    %c0_12 = arith.constant 0 : index
    %c0_13 = arith.constant 0 : index
    %18 = vector.load %arg6[%c0_12, %c0_13] : memref<512x128xbf16, #tpu.memory_space<vmem>>, vector<512x128xbf16>
    %cst_14 = arith.constant dense<0.000000e+00> : vector<16x128xf32>
    %19 = tpu.matmul %17, %18, %cst_14 {dimension_numbers = #tpu.dot_dimension_numbers<[1], [0], [0], [1], [0, 0, 1, 1], [], []>} : vector<16x512xbf16>, vector<512x128xbf16>, vector<16x128xf32> -> vector<16x128xf32>
    %c0_15 = arith.constant 0 : index
    %c0_16 = arith.constant 0 : index
    %20 = vector.load %arg7[%c0_15, %c0_16] : memref<1x128xf32, #tpu.memory_space<vmem>>, vector<1x128xf32>
    %21 = vector.broadcast %20 : vector<1x128xf32> to vector<16x128xf32>
    %22 = arith.addf %19, %21 : vector<16x128xf32>
    %c0_17 = arith.constant 0 : index
    %c0_18 = arith.constant 0 : index
    %23 = vector.load %arg8[%c0_17, %c0_18] : memref<16x128xf32, #tpu.memory_space<vmem>>, vector<16x128xf32>
    tpu.vector_store %arg8[%c0_17, %c0_18], %22 {strides = array<i32>} : memref<16x128xf32, #tpu.memory_space<vmem>>, vector<16x128xf32>,
    return
  }
  func.func @transform_0(%arg0: i32) -> (i32, i32) {
    %c0_i32 = arith.constant 0 : i32
    %c0_i32_0 = arith.constant 0 : i32
    return %arg0, %c0_i32 : i32, i32
  }
  func.func @transform_1(%arg0: i32) -> (i32, i32) {
    %c0_i32 = arith.constant 0 : i32
    %c0_i32_0 = arith.constant 0 : i32
    %c0_i32_1 = arith.constant 0 : i32
    return %c0_i32, %c0_i32_0 : i32, i32
  }
  func.func @transform_2(%arg0: i32) -> (i32, i32) {
    %c0_i32 = arith.constant 0 : i32
    %c0_i32_0 = arith.constant 0 : i32
    %c0_i32_1 = arith.constant 0 : i32
    return %c0_i32, %c0_i32_0 : i32, i32
  }
  func.func @transform_3(%arg0: i32) -> (i32, i32) {
    %c0_i32 = arith.constant 0 : i32
    %c0_i32_0 = arith.constant 0 : i32
    %c0_i32_1 = arith.constant 0 : i32
    return %c0_i32, %c0_i32_0 : i32, i32
  }
  func.func @transform_4(%arg0: i32) -> (i32, i32) {
    %c0_i32 = arith.constant 0 : i32
    %c0_i32_0 = arith.constant 0 : i32
    %c0_i32_1 = arith.constant 0 : i32
    return %c0_i32, %c0_i32_0 : i32, i32
  }
  func.func @transform_5(%arg0: i32) -> (i32, i32) {
    %c0_i32 = arith.constant 0 : i32
    %c0_i32_0 = arith.constant 0 : i32
    %c0_i32_1 = arith.constant 0 : i32
    return %c0_i32, %c0_i32_0 : i32, i32
  }
  func.func @transform_6(%arg0: i32) -> (i32, i32) {
    %c0_i32 = arith.constant 0 : i32
    %c0_i32_0 = arith.constant 0 : i32
    %c0_i32_1 = arith.constant 0 : i32
    return %c0_i32, %c0_i32_0 : i32, i32
  }
  func.func @transform_7(%arg0: i32) -> (i32, i32) {
    %c0_i32 = arith.constant 0 : i32
    %c0_i32_0 = arith.constant 0 : i32
    return %arg0, %c0_i32 : i32, i32
  }
}

</mosaic_0001>

<bundles_post_ra>
// kernel: yijin_forward.1
= control target key start
LH: loop header
LB: loop body
LE: loop exit
PB: predicated region body
PF: predicated region fallthrough
CT: control target
= control target key end

     0   :  { %12 = vsyncpa [#allocation3], 0  ;;  %s3893_s24 = smov [#allocation2]   ;;  %s4749_s0 = inlined_call_operand.vmem [shape: f32[16,784], index: 0, kind: input, shape index: {}]   ;;  %s4750_s1 = inlined_call_operand.vmem [shape: bf16[784,512], index: 1, kind: input, shape index: {}]   ;;  %s4751_s2 = inlined_call_operand.vmem [shape: f32[1,512], index: 2, kind: input, shape index: {}]   ;;  %s4752_s3 = inlined_call_operand.hbm [shape: bf16[512,512], index: 3, kind: input, shape index: {}]   ;;  %s4753_s4 = inlined_call_operand.vmem [shape: f32[1,512], index: 4, kind: input, shape index: {}]   ;;  %s4754_s5 = inlined_call_operand.vmem [shape: bf16[512,128], index: 5, kind: input, shape index: {}]   ;;  %s4755_s6 = inlined_call_operand.vmem [shape: f32[1,128], index: 6, kind: input, shape index: {}]   ;;  %s4756_s7 = inlined_call_operand.vmem [shape: f32[16,128], index: 7, kind: output, shape index: {}]  }
   0x1   :  { %s24_s25 = sshll.u32 %s3893_s24, 4  ;;  %s25_s25 = int_to_ptr.vmem [resolvable:$true] %s24_s25 }
   0x2   :  { %s3879_s26 = scalar_lea.vmem %s25_s25, 16384  ;;  %p3884_p1 = scmp.lt.s32.totalorder %s25_s25, %s25_s25 }
   0x3   :  { %p3880_p0 = scmp.ne.s32.totalorder %s25_s25, %s3879_s26  ;;  %p3885_p2 = scmp.lt.s32.totalorder %s3879_s26, %s3879_s26 }
   0x5   :  { %p3886_p3 = por %p3885_p2, %p3884_p1 }
   0x7   :  { %p3887_p4 = pnand %p3886_p3, %p3880_p0 }
   0x9   :  { %3890 = shalt.err (!%p3887_p4)
}
   0xa   :  { %s3894_s27 = smov 256   ;;  %s3895_s28 = smov 16  }
   0xb   :  { %30 = dma.hbm_to_vmem [thread:$0]  %s4752_s3, 16384, %s25_s25, [#allocation3], %s3894_s27, %s3894_s27, %s3895_s28  }
   0xc   :  { %3891 = dma.done.wait [#allocation3], 16384  }
   0xd   :  { %3892 = vsyncadd [#allocation3], 4294950912  ;;  %v3353_v0 = vld [vmem:[%s4750_s1 + $0xe4] ss:$16 sps:$4 sm:$0xff]   ;;  %v3357_v2 = vld [vmem:[%s4750_s1 + $0xe0] ss:$16 sps:$4 sm:$0xff]  }
   0xe   :  { %v3355_v1 = vld [vmem:[%s4750_s1 + $0x2e4] ss:$16 sps:$4 sm:$0xff]   ;;  %1264 = vmatprep.subr.bf16.mxu0 %v3353_v0  ;;  %v3358_v3 = vld [vmem:[%s4750_s1 + $0x2e0] ss:$16 sps:$4 sm:$0xff]   ;;  %v42_v46 = vld [vmem:[%s4749_s0 + $0x8] sm:$0xff]  ;;  %vm1260_vm0 = vcmask 130048  }
   0xf   :  { %1307 = vmatprep.subr.bf16.mxu1 %v3355_v1  ;;  %v3359_v4 = vld [vmem:[%s4750_s1 + $0xc4] ss:$16 sps:$4 sm:$0xff]   ;;  %1265 = vmatpush1.bf16.msra.mxu0 %v3357_v2  ;;  %v3363_v6 = vld [vmem:[%s4750_s1 + $0xc0] ss:$16 sps:$4 sm:$0xff]   ;;  %v44_v48 = vld [vmem:[%s4749_s0 + $0x18] sm:$0xff] }
  0x10   :  { %1308 = vmatpush1.bf16.msra.mxu1 %v3358_v3  ;;  %v3361_v5 = vld [vmem:[%s4750_s1 + $0x2c4] ss:$16 sps:$4 sm:$0xff]   ;;  %1266 = vmatprep.subr.bf16.mxu0 %v3359_v4  ;;  %v3364_v7 = vld [vmem:[%s4750_s1 + $0x2c0] ss:$16 sps:$4 sm:$0xff]  }
  0x11   :  { %1309 = vmatprep.subr.bf16.mxu1 %v3361_v5  ;;  %v3365_v8 = vld [vmem:[%s4750_s1 + $0xa4] ss:$16 sps:$4 sm:$0xff]   ;;  %v3369_v10 = vld [vmem:[%s4750_s1 + $0xa0] ss:$16 sps:$4 sm:$0xff]  }
  0x12   :  { %v3367_v9 = vld [vmem:[%s4750_s1 + $0x2a4] ss:$16 sps:$4 sm:$0xff]   ;;  %v3370_v11 = vld [vmem:[%s4750_s1 + $0x2a0] ss:$16 sps:$4 sm:$0xff]  }
  0x13   :  { %1267 = vmatpush1.bf16.msra.mxu0 %v3363_v6  ;;  %v3371_v12 = vld [vmem:[%s4750_s1 + $0x84] ss:$16 sps:$4 sm:$0xff]   ;;  %v3375_v14 = vld [vmem:[%s4750_s1 + $0x80] ss:$16 sps:$4 sm:$0xff]  }
  0x14   :  { %1310 = vmatpush1.bf16.msra.mxu1 %v3364_v7  ;;  %1268 = vmatprep.subr.bf16.mxu0 %v3365_v8  ;;  %v3373_v13 = vld [vmem:[%s4750_s1 + $0x284] ss:$16 sps:$4 sm:$0xff]   ;;  %v3376_v15 = vld [vmem:[%s4750_s1 + $0x280] ss:$16 sps:$4 sm:$0xff]   ;;  %v48_v7 = vld [vmem:[%s4749_s0 + $0x38] sm:$0xff] }
  0x15   :  { %1311 = vmatprep.subr.bf16.mxu1 %v3367_v9  ;;  %v3377_v16 = vld [vmem:[%s4750_s1 + $0x64] ss:$16 sps:$4 sm:$0xff]   ;;  %v3381_v18 = vld [vmem:[%s4750_s1 + $0x60] ss:$16 sps:$4 sm:$0xff]   ;;  %v50_v9 = vld [vmem:[%s4749_s0 + $0x48] sm:$0xff] }
  0x16   :  { %v3379_v17 = vld [vmem:[%s4750_s1 + $0x264] ss:$16 sps:$4 sm:$0xff]   ;;  %v3382_v19 = vld [vmem:[%s4750_s1 + $0x260] ss:$16 sps:$4 sm:$0xff]  }
  0x17   :  { %1269 = vmatpush1.bf16.msra.mxu0 %v3369_v10  ;;  %v3383_v20 = vld [vmem:[%s4750_s1 + $0x44] ss:$16 sps:$4 sm:$0xff]   ;;  %v3387_v22 = vld [vmem:[%s4750_s1 + $0x40] ss:$16 sps:$4 sm:$0xff]  }
  0x18   :  { %1312 = vmatpush1.bf16.msra.mxu1 %v3370_v11  ;;  %1270 = vmatprep.subr.bf16.mxu0 %v3371_v12  ;;  %v3385_v21 = vld [vmem:[%s4750_s1 + $0x244] ss:$16 sps:$4 sm:$0xff]   ;;  %v3388_v23 = vld [vmem:[%s4750_s1 + $0x240] ss:$16 sps:$4 sm:$0xff]  }
  0x19   :  { %1313 = vmatprep.subr.bf16.mxu1 %v3373_v13  ;;  %v3389_v24 = vld [vmem:[%s4750_s1 + $0x24] ss:$16 sps:$4 sm:$0xff]   ;;  %v3393_v26 = vld [vmem:[%s4750_s1 + $0x20] ss:$16 sps:$4 sm:$0xff]  }
  0x1a   :  { %v3391_v25 = vld [vmem:[%s4750_s1 + $0x224] ss:$16 sps:$4 sm:$0xff]   ;;  %v3394_v27 = vld [vmem:[%s4750_s1 + $0x220] ss:$16 sps:$4 sm:$0xff]  }
  0x1b   :  { %1271 = vmatpush1.bf16.msra.mxu0 %v3375_v14  ;;  %v3395_v28 = vld [vmem:[%s4750_s1 + $0x4] ss:$16 sps:$4 sm:$0xff]   ;;  %v3399_v30 = vld [vmem:[%s4750_s1] ss:$16 sps:$4 sm:$0xff]  }
  0x1c   :  { %1314 = vmatpush1.bf16.msra.mxu1 %v3376_v15  ;;  %1272 = vmatprep.subr.bf16.mxu0 %v3377_v16  ;;  %v3397_v29 = vld [vmem:[%s4750_s1 + $0x204] ss:$16 sps:$4 sm:$0xff]   ;;  %v3400_v31 = vld [vmem:[%s4750_s1 + $0x200] ss:$16 sps:$4 sm:$0xff]  }
  0x1d   :  { %1315 = vmatprep.subr.bf16.mxu1 %v3379_v17  ;;  %v3401_v32 = vld [vmem:[%s4750_s1 + $0x1e4] ss:$16 sps:$4 sm:$0xff]   ;;  %v3405_v34 = vld [vmem:[%s4750_s1 + $0x1e0] ss:$16 sps:$4 sm:$0xff]   ;;  %v3460_v17 = vld [vmem:[%s4750_s1 + $0xec] ss:$16 sps:$4 sm:$0xff]  }
  0x1e   :  { %v3403_v33 = vld [vmem:[%s4750_s1 + $0x3e4] ss:$16 sps:$4 sm:$0xff]   ;;  %v3406_v35 = vld [vmem:[%s4750_s1 + $0x3e0] ss:$16 sps:$4 sm:$0xff]  }
  0x1f   :  { %1273 = vmatpush1.bf16.msra.mxu0 %v3381_v18  ;;  %v3407_v36 = vld [vmem:[%s4750_s1 + $0x1c4] ss:$16 sps:$4 sm:$0xff]   ;;  %v3411_v38 = vld [vmem:[%s4750_s1 + $0x1c0] ss:$16 sps:$4 sm:$0xff]  }
  0x20   :  { %1316 = vmatpush1.bf16.msra.mxu1 %v3382_v19  ;;  %1274 = vmatprep.subr.bf16.mxu0 %v3383_v20  ;;  %v3409_v37 = vld [vmem:[%s4750_s1 + $0x3c4] ss:$16 sps:$4 sm:$0xff]   ;;  %v3412_v39 = vld [vmem:[%s4750_s1 + $0x3c0] ss:$16 sps:$4 sm:$0xff]   ;;  %v54_v20 = vld [vmem:[%s4749_s0 + $0x68] sm:$0xff] }
  0x21   :  { %1317 = vmatprep.subr.bf16.mxu1 %v3385_v21  ;;  %v3413_v40 = vld [vmem:[%s4750_s1 + $0x1a4] ss:$16 sps:$4 sm:$0xff]   ;;  %v3417_v42 = vld [vmem:[%s4750_s1 + $0x1a0] ss:$16 sps:$4 sm:$0xff]   ;;  %v3896_v21 = vmov 0  }
  0x22   :  { %v3415_v41 = vld [vmem:[%s4750_s1 + $0x3a4] ss:$16 sps:$4 sm:$0xff]   ;;  %v3418_v43 = vld [vmem:[%s4750_s1 + $0x3a0] ss:$16 sps:$4 sm:$0xff]  }
  0x23   :  { %1275 = vmatpush1.bf16.msra.mxu0 %v3387_v22  ;;  %v3419_v44 = vld [vmem:[%s4750_s1 + $0x184] ss:$16 sps:$4 sm:$0xff]   ;;  %v3423_v50 = vld [vmem:[%s4750_s1 + $0x180] ss:$16 sps:$4 sm:$0xff]  }
  0x24   :  { %1318 = vmatpush1.bf16.msra.mxu1 %v3388_v23  ;;  %1276 = vmatprep.subr.bf16.mxu0 %v3389_v24  ;;  %v3421_v45 = vld [vmem:[%s4750_s1 + $0x384] ss:$16 sps:$4 sm:$0xff]   ;;  %v3424_v51 = vld [vmem:[%s4750_s1 + $0x380] ss:$16 sps:$4 sm:$0xff]   ;;  %v3458_v24 = vld [vmem:[%s4750_s1 + $0xe8] ss:$16 sps:$4 sm:$0xff]  }
  0x25   :  { %1319 = vmatprep.subr.bf16.mxu1 %v3391_v25  ;;  %v49_v47 = vld [vmem:[%s4749_s0 + $0x40] sm:$0xff]  ;;  %v51_v49 = vld [vmem:[%s4749_s0 + $0x50] sm:$0xff] }
  0x26   :  { %v3425_v52 = vld [vmem:[%s4750_s1 + $0x164] ss:$16 sps:$4 sm:$0xff]   ;;  %v4099_v53 = vpack.c.bf16 %v49_v47, %v42_v46  ;;  %v4101_v54 = vpack.c.bf16 %v51_v49, %v44_v48  ;;  %v3429_v56 = vld [vmem:[%s4750_s1 + $0x160] ss:$16 sps:$4 sm:$0xff]   ;;  %v3488_v47 = vld [vmem:[%s4750_s1 + $0x48] ss:$16 sps:$4 sm:$0xff]  }
  0x27   :  { %1277 = vmatpush1.bf16.msra.mxu0 %v3393_v26  ;;  %v3427_v55 = vld [vmem:[%s4750_s1 + $0x364] ss:$16 sps:$4 sm:$0xff]   ;;  %v3430_v57 = vld [vmem:[%s4750_s1 + $0x360] ss:$16 sps:$4 sm:$0xff]   ;;  %v3466_v26 = vld [vmem:[%s4750_s1 + $0xcc] ss:$16 sps:$4 sm:$0xff]  }
  0x28   :  { %1320 = vmatpush1.bf16.msra.mxu1 %v3394_v27  ;;  %1278 = vmatprep.subr.bf16.mxu0 %v3395_v28  ;;  %v3431_v58 = vld [vmem:[%s4750_s1 + $0x144] ss:$16 sps:$4 sm:$0xff]   ;;  %v3435_v60 = vld [vmem:[%s4750_s1 + $0x140] ss:$16 sps:$4 sm:$0xff]   ;;  %v3464_v28 = vld [vmem:[%s4750_s1 + $0xc8] ss:$16 sps:$4 sm:$0xff]  }
  0x29   :  { %1321 = vmatprep.subr.bf16.mxu1 %v3397_v29  ;;  %1296 = vmatprep.mubr.bf16.mxu0 %v4099_v53  ;;  %v3433_v59 = vld [vmem:[%s4750_s1 + $0x344] ss:$16 sps:$4 sm:$0xff]   ;;  %v3436_v61 = vld [vmem:[%s4750_s1 + $0x340] ss:$16 sps:$4 sm:$0xff]   ;;  %v3496_v49 = vld [vmem:[%s4750_s1 + $0x2c] ss:$16 sps:$4 sm:$0xff]  }
  0x2a   :  { %1339 = vmatprep.mubr.bf16.mxu1 %v4101_v54  ;;  %v3437_v62 = vld [vmem:[%s4750_s1 + $0x124] ss:$16 sps:$4 sm:$0xff]   ;;  %v3441_v0 = vld [vmem:[%s4750_s1 + $0x120] ss:$16 sps:$4 sm:$0xff]  }
  0x2b   :  { %1279 = vmatpush1.bf16.msra.mxu0 %v3399_v30  ;;  %v3439_v63 = vld [vmem:[%s4750_s1 + $0x324] ss:$16 sps:$4 sm:$0xff]   ;;  %v3442_v1 = vld [vmem:[%s4750_s1 + $0x320] ss:$16 sps:$4 sm:$0xff]   ;;  %v3472_v30 = vld [vmem:[%s4750_s1 + $0xac] ss:$16 sps:$4 sm:$0xff]  }
  0x2c   :  { %1322 = vmatpush1.bf16.msra.mxu1 %v3400_v31  ;;  %1280 = vmatprep.subr.bf16.mxu0 %v3401_v32  ;;  %v3443_v2 = vld [vmem:[%s4750_s1 + $0x104] ss:$16 sps:$4 sm:$0xff]   ;;  %v3447_v4 = vld [vmem:[%s4750_s1 + $0x100] ss:$16 sps:$4 sm:$0xff]   ;;  %v3470_v32 = vld [vmem:[%s4750_s1 + $0xa8] ss:$16 sps:$4 sm:$0xff]  }
  0x2d   :  { %1323 = vmatprep.subr.bf16.mxu1 %v3403_v33  ;;  %v3445_v3 = vld [vmem:[%s4750_s1 + $0x304] ss:$16 sps:$4 sm:$0xff]   ;;  %v3448_v5 = vld [vmem:[%s4750_s1 + $0x300] ss:$16 sps:$4 sm:$0xff]  }
  0x2e   :  { %v41_v6 = vld [vmem:[%s4749_s0] sm:$0xff]  ;;  %v43_v8 = vld [vmem:[%s4749_s0 + $0x10] sm:$0xff] }
  0x2f   :  { %1281 = vmatpush2.bf16.msra.mxu0 %v3405_v34  ;;  %v3451_v10 = vld [vmem:[%s4750_s1 + $0x4e4] ss:$16 sps:$4 sm:$0xff]   ;;  %v4168_v12 = vpack.c.bf16 %v48_v7, %v41_v6  ;;  %v4170_v13 = vpack.c.bf16 %v50_v9, %v43_v8  ;;  %v3449_v14 = vld [vmem:[%s4750_s1 + $0x4e0] ss:$16 sps:$4 sm:$0xff]   ;;  %v3478_v34 = vld [vmem:[%s4750_s1 + $0x8c] ss:$16 sps:$4 sm:$0xff]  }
  0x30   :  { %1324 = vmatpush2.bf16.msra.mxu1 %v3406_v35  ;;  %1282 = vmatprep.subr.bf16.mxu0 %v3407_v36  ;;  %v3454_v11 = vld [vmem:[%s4750_s1 + $0x604] ss:$16 sps:$4 sm:$0xff]   ;;  %v3452_v15 = vld [vmem:[%s4750_s1 + $0x600] ss:$16 sps:$4 sm:$0xff]   ;;  %v3476_v36 = vld [vmem:[%s4750_s1 + $0x88] ss:$16 sps:$4 sm:$0xff]  }
  0x31   :  { %1325 = vmatprep.subr.bf16.mxu1 %v3409_v37  ;;  %v3457_v16 = vld [vmem:[%s4750_s1 + $0x4c4] ss:$16 sps:$4 sm:$0xff]   ;;  %v3455_v18 = vld [vmem:[%s4750_s1 + $0x4c0] ss:$16 sps:$4 sm:$0xff]   ;;  %v3526_v6 = vld [vmem:[%s4750_s1 + $0x18c] ss:$16 sps:$4 sm:$0xff]  }
  0x32   :  { %v47_v19 = vld [vmem:[%s4749_s0 + $0x30] sm:$0xff]  ;;  %v3524_v8 = vld [vmem:[%s4750_s1 + $0x188] ss:$16 sps:$4 sm:$0xff]  }
  0x33   :  { %1283 = vmatpush2.bf16.msra.mxu0 %v3411_v38  ;;  %v3463_v22 = vld [vmem:[%s4750_s1 + $0x4a4] ss:$16 sps:$4 sm:$0xff]   ;;  %v4199_v23 = vpack.c.bf16 %v54_v20, %v47_v19  ;;  %v3461_v25 = vld [vmem:[%s4750_s1 + $0x4a0] ss:$16 sps:$4 sm:$0xff]   ;;  %v3484_v38 = vld [vmem:[%s4750_s1 + $0x6c] ss:$16 sps:$4 sm:$0xff]  }
  0x34   :  { %1326 = vmatpush2.bf16.msra.mxu1 %v3412_v39  ;;  %1284 = vmatprep.subr.bf16.mxu0 %v3413_v40  ;;  %v3469_v27 = vld [vmem:[%s4750_s1 + $0x484] ss:$16 sps:$4 sm:$0xff]   ;;  %v3467_v29 = vld [vmem:[%s4750_s1 + $0x480] ss:$16 sps:$4 sm:$0xff]   ;;  %v3482_v40 = vld [vmem:[%s4750_s1 + $0x68] ss:$16 sps:$4 sm:$0xff]  }
  0x35   :  { %1327 = vmatprep.subr.bf16.mxu1 %v3415_v41  ;;  %v3475_v31 = vld [vmem:[%s4750_s1 + $0x464] ss:$16 sps:$4 sm:$0xff]   ;;  %v3473_v33 = vld [vmem:[%s4750_s1 + $0x460] ss:$16 sps:$4 sm:$0xff]   ;;  %v46_v41 = vld [vmem:[%s4749_s0 + $0x28] sm:$0xff] }
  0x36   :  { %v3481_v35 = vld [vmem:[%s4750_s1 + $0x444] ss:$16 sps:$4 sm:$0xff]   ;;  %v3479_v37 = vld [vmem:[%s4750_s1 + $0x440] ss:$16 sps:$4 sm:$0xff]  }
  0x37   :  { %1285 = vmatpush2.bf16.msra.mxu0 %v3417_v42  ;;  %v3487_v39 = vld [vmem:[%s4750_s1 + $0x424] ss:$16 sps:$4 sm:$0xff]   ;;  %v3491_v48 = vld [vmem:[%s4750_s1 + $0x400] ss:$16 sps:$4 sm:$0xff]  }
  0x38   :  { %1328 = vmatpush2.bf16.msra.mxu1 %v3418_v43  ;;  %1286 = vmatprep.subr.bf16.mxu0 %v3419_v44  ;;  %v53_v42 = vld [vmem:[%s4749_s0 + $0x60] sm:$0xff] }
  0x39   :  { %1329 = vmatprep.subr.bf16.mxu1 %v3421_v45  ;;  %v3485_v43 = vld [vmem:[%s4750_s1 + $0x420] ss:$16 sps:$4 sm:$0xff]   ;;  %v4264_v44 = vpack.c.bf16 %v53_v42, %v46_v41  ;;  %v3490_v45 = vld [vmem:[%s4750_s1 + $0x4c] ss:$16 sps:$4 sm:$0xff]   ;;  %v3493_v46 = vld [vmem:[%s4750_s1 + $0x404] ss:$16 sps:$4 sm:$0xff]  }
  0x3a   :  { %v3529_v7 = vld [vmem:[%s4750_s1 + $0x544] ss:$16 sps:$4 sm:$0xff]   ;;  %v3527_v9 = vld [vmem:[%s4750_s1 + $0x540] ss:$16 sps:$4 sm:$0xff]   ;;  %v3571_v41 = vld [vmem:[%s4750_s1 + $0x26c] ss:$16 sps:$4 sm:$0xff]  }
  0x3b   :  { %1287 = vmatpush2.bf16.msra.mxu0 %v3423_v50  ;;  %v3499_v50 = vld [vmem:[%s4750_s1 + $0x5e4] ss:$16 sps:$4 sm:$0xff]   ;;  %v3539_v19 = vld [vmem:[%s4750_s1 + $0x500] ss:$16 sps:$4 sm:$0xff]   ;;  %v3566_v42 = vld [vmem:[%s4750_s1 + $0x4a8] ss:$16 sps:$4 sm:$0xff]  }
  0x3c   :  { %1330 = vmatpush2.bf16.msra.mxu1 %v3424_v51  ;;  %1288 = vmatprep.subr.bf16.mxu0 %v3425_v52  ;;  %v3494_v51 = vld [vmem:[%s4750_s1 + $0x28] ss:$16 sps:$4 sm:$0xff]   ;;  %v3497_v52 = vld [vmem:[%s4750_s1 + $0x5e0] ss:$16 sps:$4 sm:$0xff]  }
  0x3d   :  { %1331 = vmatprep.subr.bf16.mxu1 %v3427_v55  ;;  %v3505_v55 = vld [vmem:[%s4750_s1 + $0x5c4] ss:$16 sps:$4 sm:$0xff]  }
  0x3e   :  { %v45_v20 = vld [vmem:[%s4749_s0 + $0x20] sm:$0xff] }
  0x3f   :  { %1289 = vmatpush2.bf16.msra.mxu0 %v3429_v56  ;;  %v3500_v56 = vld [vmem:[%s4750_s1 + $0x8] ss:$16 sps:$4 sm:$0xff]  }
  0x40   :  { %1332 = vmatpush2.bf16.msra.mxu1 %v3430_v57  ;;  %1290 = vmatprep.subr.bf16.mxu0 %v3431_v58  ;;  %v3503_v57 = vld [vmem:[%s4750_s1 + $0x5c0] ss:$16 sps:$4 sm:$0xff]   ;;  %v3508_v58 = vld [vmem:[%s4750_s1 + $0x1ec] ss:$16 sps:$4 sm:$0xff]  }
  0x41   :  { %1333 = vmatprep.subr.bf16.mxu1 %v3433_v59  ;;  %v3511_v59 = vld [vmem:[%s4750_s1 + $0x5a4] ss:$16 sps:$4 sm:$0xff]  }
  0x43   :  { %1291 = vmatpush2.bf16.msra.mxu0 %v3435_v60  ;;  %v3506_v60 = vld [vmem:[%s4750_s1 + $0x1e8] ss:$16 sps:$4 sm:$0xff]  }
  0x44   :  { %1334 = vmatpush2.bf16.msra.mxu1 %v3436_v61  ;;  %1292 = vmatprep.subr.bf16.mxu0 %v3437_v62  ;;  %v3509_v61 = vld [vmem:[%s4750_s1 + $0x5a0] ss:$16 sps:$4 sm:$0xff]   ;;  %v3514_v62 = vld [vmem:[%s4750_s1 + $0x1cc] ss:$16 sps:$4 sm:$0xff]  }
  0x45   :  { %1335 = vmatprep.subr.bf16.mxu1 %v3439_v63  ;;  %v3517_v63 = vld [vmem:[%s4750_s1 + $0x584] ss:$16 sps:$4 sm:$0xff]  }
  0x47   :  { %1293 = vmatpush2.bf16.msra.mxu0 %v3441_v0  ;;  %v3512_v0 = vld [vmem:[%s4750_s1 + $0x1c8] ss:$16 sps:$4 sm:$0xff]  }
  0x48   :  { %1336 = vmatpush2.bf16.msra.mxu1 %v3442_v1  ;;  %1294 = vmatprep.subr.bf16.mxu0 %v3443_v2  ;;  %v3515_v1 = vld [vmem:[%s4750_s1 + $0x580] ss:$16 sps:$4 sm:$0xff]   ;;  %v3520_v2 = vld [vmem:[%s4750_s1 + $0x1ac] ss:$16 sps:$4 sm:$0xff]  }
  0x49   :  { %1337 = vmatprep.subr.bf16.mxu1 %v3445_v3  ;;  %v3523_v3 = vld [vmem:[%s4750_s1 + $0x564] ss:$16 sps:$4 sm:$0xff]  }
  0x4b   :  { %1295 = vmatpush2.bf16.msra.mxu0 %v3447_v4  ;;  %v3518_v4 = vld [vmem:[%s4750_s1 + $0x1a8] ss:$16 sps:$4 sm:$0xff]  }
  0x4c   :  { %1338 = vmatpush2.bf16.msra.mxu1 %v3448_v5  ;;  %1350 = vmatprep.subr.bf16.mxu0 %v3451_v10  ;;  %v3521_v5 = vld [vmem:[%s4750_s1 + $0x560] ss:$16 sps:$4 sm:$0xff]   ;;  %v3532_v10 = vld [vmem:[%s4750_s1 + $0x16c] ss:$16 sps:$4 sm:$0xff]  }
  0x4d   :  { %1407 = vmatprep.subr.bf16.mxu1 %v3454_v11  ;;  %v3535_v11 = vld [vmem:[%s4750_s1 + $0x524] ss:$16 sps:$4 sm:$0xff]  }
  0x4e   :  { %1297 = vmatmul.mubr.bf16.vlgmr.msra.gmra.mxu0 %v4168_v12 }
  0x4f   :  { %1340 = vmatmul.mubr.bf16.vlgmr.msra.gmra.mxu1 %v4170_v13  ;;  %1351 = vmatpush1.bf16.msra.mxu0 %v3449_v14  ;;  %v3530_v14 = vld [vmem:[%s4750_s1 + $0x168] ss:$16 sps:$4 sm:$0xff]  }
  0x50   :  { %1408 = vmatpush1.bf16.msra.mxu1 %v3452_v15  ;;  %1352 = vmatprep.subr.bf16.mxu0 %v3457_v16  ;;  %v3533_v15 = vld [vmem:[%s4750_s1 + $0x520] ss:$16 sps:$4 sm:$0xff]   ;;  %v3538_v16 = vld [vmem:[%s4750_s1 + $0x14c] ss:$16 sps:$4 sm:$0xff]  }
  0x51   :  { %1425 = vmatprep.mubr.bf16.mxu1 %v3896_v21  ;;  %1436 = vmatprep.subr.bf16.mxu1 %v3460_v17  ;;  %v3541_v17 = vld [vmem:[%s4750_s1 + $0x504] ss:$16 sps:$4 sm:$0xff]  }
  0x52   :  { %1382 = vmatprep.mubr.bf16.mxu0 %v4264_v44 }
  0x53   :  { %1353 = vmatpush1.bf16.msra.mxu0 %v3455_v18  ;;  %v3536_v18 = vld [vmem:[%s4750_s1 + $0x148] ss:$16 sps:$4 sm:$0xff]  }
  0x54   :  { %1354 = vmatprep.subr.bf16.mxu0 %v3463_v22  ;;  %v52_v22 = vld [vmem:[%s4749_s0 + $0x58] sm:$0xff] }
  0x57   :  { %3142 = vmatmul.mubr.msk.bf16.vlgmr.msra.gmra.mxu1 %vm1260_vm0, %v4199_v23  ;;  %1355 = vmatpush1.bf16.msra.mxu0 %v3461_v25  ;;  %v3547_v25 = vld [vmem:[%s4750_s1 + $0x2ec] ss:$16 sps:$4 sm:$0xff]  }
  0x58   :  { %1437 = vmatpush1.bf16.msra.mxu1 %v3458_v24  ;;  %1356 = vmatprep.subr.bf16.mxu0 %v3469_v27  ;;  %v3544_v24 = vld [vmem:[%s4750_s1 + $0x12c] ss:$16 sps:$4 sm:$0xff]   ;;  %v3542_v27 = vld [vmem:[%s4750_s1 + $0x128] ss:$16 sps:$4 sm:$0xff]  }
  0x59   :  { %1438 = vmatprep.subr.bf16.mxu1 %v3466_v26  ;;  %1468 = vmatprep.mubr.bf16.mxu1 %v4099_v53  ;;  %v3502_v53 = vld [vmem:[%s4750_s1 + $0xc] ss:$16 sps:$4 sm:$0xff]   ;;  %v4387_v26 = vpack.c.bf16 %v52_v22, %v45_v20  ;;  %v3626_v20 = vld [vmem:[%s4750_s1 + $0x568] ss:$16 sps:$4 sm:$0xff]  }
  0x5a   :  { %v3629_v22 = vld [vmem:[%s4750_s1 + $0x328] ss:$16 sps:$4 sm:$0xff]  }
  0x5b   :  { %1357 = vmatpush1.bf16.msra.mxu0 %v3467_v29  ;;  %v3550_v29 = vld [vmem:[%s4750_s1 + $0x10c] ss:$16 sps:$4 sm:$0xff]  }
  0x5c   :  { %1439 = vmatpush1.bf16.msra.mxu1 %v3464_v28  ;;  %1358 = vmatprep.subr.bf16.mxu0 %v3475_v31  ;;  %v3545_v28 = vld [vmem:[%s4750_s1 + $0x2e8] ss:$16 sps:$4 sm:$0xff]  }
  0x5d   :  { %1440 = vmatprep.subr.bf16.mxu1 %v3472_v30  ;;  %v3553_v30 = vld [vmem:[%s4750_s1 + $0x2cc] ss:$16 sps:$4 sm:$0xff]   ;;  %v3548_v31 = vld [vmem:[%s4750_s1 + $0x108] ss:$16 sps:$4 sm:$0xff]  }
  0x5f   :  { %1359 = vmatpush1.bf16.msra.mxu0 %v3473_v33  ;;  %v3556_v33 = vld [vmem:[%s4750_s1 + $0x4ec] ss:$16 sps:$4 sm:$0xff]  }
  0x60   :  { %1441 = vmatpush1.bf16.msra.mxu1 %v3470_v32  ;;  %1360 = vmatprep.subr.bf16.mxu0 %v3481_v35  ;;  %v3551_v32 = vld [vmem:[%s4750_s1 + $0x2c8] ss:$16 sps:$4 sm:$0xff]  }
  0x61   :  { %1442 = vmatprep.subr.bf16.mxu1 %v3478_v34  ;;  %v3559_v34 = vld [vmem:[%s4750_s1 + $0x2ac] ss:$16 sps:$4 sm:$0xff]   ;;  %v3554_v35 = vld [vmem:[%s4750_s1 + $0x4e8] ss:$16 sps:$4 sm:$0xff]  }
  0x63   :  { %1361 = vmatpush1.bf16.msra.mxu0 %v3479_v37  ;;  %v3562_v37 = vld [vmem:[%s4750_s1 + $0x4cc] ss:$16 sps:$4 sm:$0xff]  }
  0x64   :  { %1443 = vmatpush1.bf16.msra.mxu1 %v3476_v36  ;;  %1362 = vmatprep.subr.bf16.mxu0 %v3487_v39  ;;  %v3557_v36 = vld [vmem:[%s4750_s1 + $0x2a8] ss:$16 sps:$4 sm:$0xff]  }
  0x65   :  { %1444 = vmatprep.subr.bf16.mxu1 %v3484_v38  ;;  %v3565_v38 = vld [vmem:[%s4750_s1 + $0x28c] ss:$16 sps:$4 sm:$0xff]   ;;  %v3560_v39 = vld [vmem:[%s4750_s1 + $0x4c8] ss:$16 sps:$4 sm:$0xff]  }
  0x67   :  { %1363 = vmatpush1.bf16.msra.mxu0 %v3485_v43  ;;  %v3574_v43 = vld [vmem:[%s4750_s1 + $0x48c] ss:$16 sps:$4 sm:$0xff]  }
  0x68   :  { %1445 = vmatpush1.bf16.msra.mxu1 %v3482_v40  ;;  %1364 = vmatprep.subr.bf16.mxu0 %v3493_v46  ;;  %v3568_v40 = vld [vmem:[%s4750_s1 + $0x4ac] ss:$16 sps:$4 sm:$0xff]   ;;  %v3572_v46 = vld [vmem:[%s4750_s1 + $0x488] ss:$16 sps:$4 sm:$0xff]  }
  0x69   :  { %1446 = vmatprep.subr.bf16.mxu1 %v3490_v45  ;;  %v3577_v45 = vld [vmem:[%s4750_s1 + $0x24c] ss:$16 sps:$4 sm:$0xff]  }
  0x6b   :  { %1365 = vmatpush1.bf16.msra.mxu0 %v3491_v48  ;;  %v3583_v48 = vld [vmem:[%s4750_s1 + $0x22c] ss:$16 sps:$4 sm:$0xff]  }
  0x6c   :  { %1447 = vmatpush1.bf16.msra.mxu1 %v3488_v47  ;;  %1366 = vmatprep.subr.bf16.mxu0 %v3499_v50  ;;  %v3580_v47 = vld [vmem:[%s4750_s1 + $0x46c] ss:$16 sps:$4 sm:$0xff]   ;;  %v3581_v50 = vld [vmem:[%s4750_s1 + $0x228] ss:$16 sps:$4 sm:$0xff]  }
  0x6d   :  { %1448 = vmatprep.subr.bf16.mxu1 %v3496_v49  ;;  %v3578_v49 = vld [vmem:[%s4750_s1 + $0x468] ss:$16 sps:$4 sm:$0xff]  }
  0x6f   :  { %1367 = vmatpush2.bf16.msra.mxu0 %v3497_v52  ;;  %v3589_v52 = vld [vmem:[%s4750_s1 + $0x20c] ss:$16 sps:$4 sm:$0xff]  }
  0x70   :  { %1449 = vmatpush1.bf16.msra.mxu1 %v3494_v51  ;;  %1368 = vmatprep.subr.bf16.mxu0 %v3505_v55  ;;  %v3586_v51 = vld [vmem:[%s4750_s1 + $0x44c] ss:$16 sps:$4 sm:$0xff]   ;;  %v3587_v55 = vld [vmem:[%s4750_s1 + $0x208] ss:$16 sps:$4 sm:$0xff]  }
  0x71   :  { %1450 = vmatprep.subr.bf16.mxu1 %v3502_v53  ;;  %v3584_v53 = vld [vmem:[%s4750_s1 + $0x448] ss:$16 sps:$4 sm:$0xff]  }
  0x73   :  { %1369 = vmatpush2.bf16.msra.mxu0 %v3503_v57  ;;  %v3595_v57 = vld [vmem:[%s4750_s1 + $0x3ec] ss:$16 sps:$4 sm:$0xff]  }
  0x74   :  { %1451 = vmatpush1.bf16.msra.mxu1 %v3500_v56  ;;  %1370 = vmatprep.subr.bf16.mxu0 %v3511_v59  ;;  %v3592_v56 = vld [vmem:[%s4750_s1 + $0x42c] ss:$16 sps:$4 sm:$0xff]   ;;  %v3593_v59 = vld [vmem:[%s4750_s1 + $0x3e8] ss:$16 sps:$4 sm:$0xff]  }
  0x75   :  { %1452 = vmatprep.subr.bf16.mxu1 %v3508_v58  ;;  %v3590_v58 = vld [vmem:[%s4750_s1 + $0x428] ss:$16 sps:$4 sm:$0xff]  }
  0x77   :  { %1371 = vmatpush2.bf16.msra.mxu0 %v3509_v61  ;;  %v3601_v61 = vld [vmem:[%s4750_s1 + $0x3cc] ss:$16 sps:$4 sm:$0xff]  }
  0x78   :  { %1453 = vmatpush2.bf16.msra.mxu1 %v3506_v60  ;;  %1372 = vmatprep.subr.bf16.mxu0 %v3517_v63  ;;  %v3598_v60 = vld [vmem:[%s4750_s1 + $0x40c] ss:$16 sps:$4 sm:$0xff]   ;;  %v3599_v63 = vld [vmem:[%s4750_s1 + $0x3c8] ss:$16 sps:$4 sm:$0xff]  }
  0x79   :  { %1454 = vmatprep.subr.bf16.mxu1 %v3514_v62  ;;  %v3596_v62 = vld [vmem:[%s4750_s1 + $0x408] ss:$16 sps:$4 sm:$0xff]  }
  0x7b   :  { %1373 = vmatpush2.bf16.msra.mxu0 %v3515_v1  ;;  %v3607_v1 = vld [vmem:[%s4750_s1 + $0x3ac] ss:$16 sps:$4 sm:$0xff]  }
  0x7c   :  { %1455 = vmatpush2.bf16.msra.mxu1 %v3512_v0  ;;  %1374 = vmatprep.subr.bf16.mxu0 %v3523_v3  ;;  %v3604_v0 = vld [vmem:[%s4750_s1 + $0x5ec] ss:$16 sps:$4 sm:$0xff]   ;;  %v3605_v3 = vld [vmem:[%s4750_s1 + $0x3a8] ss:$16 sps:$4 sm:$0xff]  }
  0x7d   :  { %1456 = vmatprep.subr.bf16.mxu1 %v3520_v2  ;;  %v3602_v2 = vld [vmem:[%s4750_s1 + $0x5e8] ss:$16 sps:$4 sm:$0xff]  }
  0x7f   :  { %1375 = vmatpush2.bf16.msra.mxu0 %v3521_v5  ;;  %v3613_v5 = vld [vmem:[%s4750_s1 + $0x38c] ss:$16 sps:$4 sm:$0xff]  }
  0x80   :  { %1457 = vmatpush2.bf16.msra.mxu1 %v3518_v4  ;;  %1376 = vmatprep.subr.bf16.mxu0 %v3529_v7  ;;  %v3610_v4 = vld [vmem:[%s4750_s1 + $0x5cc] ss:$16 sps:$4 sm:$0xff]   ;;  %v3611_v7 = vld [vmem:[%s4750_s1 + $0x388] ss:$16 sps:$4 sm:$0xff]  }
  0x81   :  { %1458 = vmatprep.subr.bf16.mxu1 %v3526_v6  ;;  %v3608_v6 = vld [vmem:[%s4750_s1 + $0x5c8] ss:$16 sps:$4 sm:$0xff]  }
  0x83   :  { %1377 = vmatpush2.bf16.msra.mxu0 %v3527_v9  ;;  %v3619_v9 = vld [vmem:[%s4750_s1 + $0x36c] ss:$16 sps:$4 sm:$0xff]  }
  0x84   :  { %1459 = vmatpush2.bf16.msra.mxu1 %v3524_v8  ;;  %1378 = vmatprep.subr.bf16.mxu0 %v3535_v11  ;;  %v3616_v8 = vld [vmem:[%s4750_s1 + $0x5ac] ss:$16 sps:$4 sm:$0xff]   ;;  %v3617_v11 = vld [vmem:[%s4750_s1 + $0x368] ss:$16 sps:$4 sm:$0xff]  }
  0x85   :  { %1460 = vmatprep.subr.bf16.mxu1 %v3532_v10  ;;  %v3614_v10 = vld [vmem:[%s4750_s1 + $0x5a8] ss:$16 sps:$4 sm:$0xff]  }
  0x87   :  { %1379 = vmatpush2.bf16.msra.mxu0 %v3533_v15  ;;  %v3625_v15 = vld [vmem:[%s4750_s1 + $0x34c] ss:$16 sps:$4 sm:$0xff]  }
  0x88   :  { %1461 = vmatpush2.bf16.msra.mxu1 %v3530_v14  ;;  %1380 = vmatprep.subr.bf16.mxu0 %v3541_v17  ;;  %v3622_v14 = vld [vmem:[%s4750_s1 + $0x58c] ss:$16 sps:$4 sm:$0xff]   ;;  %v3623_v17 = vld [vmem:[%s4750_s1 + $0x348] ss:$16 sps:$4 sm:$0xff]  }
  0x89   :  { %1462 = vmatprep.subr.bf16.mxu1 %v3538_v16  ;;  %v3620_v16 = vld [vmem:[%s4750_s1 + $0x588] ss:$16 sps:$4 sm:$0xff]  }
  0x8b   :  { %1381 = vmatpush2.bf16.msra.mxu0 %v3539_v19  ;;  %v3631_v19 = vld [vmem:[%s4750_s1 + $0x32c] ss:$16 sps:$4 sm:$0xff]  }
  0x8c   :  { %1463 = vmatpush2.bf16.msra.mxu1 %v3536_v18  ;;  %1479 = vmatprep.subr.bf16.mxu0 %v3547_v25  ;;  %v3628_v18 = vld [vmem:[%s4750_s1 + $0x56c] ss:$16 sps:$4 sm:$0xff]  }
  0x8d   :  { %1464 = vmatprep.subr.bf16.mxu1 %v3544_v24  ;;  %v3634_v24 = vld [vmem:[%s4750_s1 + $0x54c] ss:$16 sps:$4 sm:$0xff]  }
  0x8e   :  { %1383 = vmatmul.mubr.bf16.vlgmr.msra.gmra.mxu0 %v4387_v26  ;;  %v3637_v25 = vld [vmem:[%s4750_s1 + $0x30c] ss:$16 sps:$4 sm:$0xff]  }
  0x8f   :  { %1480 = vmatpush1.bf16.msra.mxu0 %v3545_v28  ;;  %1511 = vmatprep.mubr.bf16.mxu0 %v4101_v54  ;;  %v3563_v54 = vld [vmem:[%s4750_s1 + $0x288] ss:$16 sps:$4 sm:$0xff]  }
  0x90   :  { %1465 = vmatpush2.bf16.msra.mxu1 %v3542_v27  ;;  %1481 = vmatprep.subr.bf16.mxu0 %v3553_v30  ;;  %v3632_v27 = vld [vmem:[%s4750_s1 + $0x548] ss:$16 sps:$4 sm:$0xff]   ;;  %v3643_v30 = vld [vmem:[%s4750_s1 + $0x60c] ss:$16 sps:$4 sm:$0xff]  }
  0x91   :  { %1466 = vmatprep.subr.bf16.mxu1 %v3550_v29  ;;  %v3635_v28 = vld [vmem:[%s4750_s1 + $0x308] ss:$16 sps:$4 sm:$0xff]   ;;  %v3640_v29 = vld [vmem:[%s4750_s1 + $0x52c] ss:$16 sps:$4 sm:$0xff]  }
  0x93   :  { %1482 = vmatpush1.bf16.msra.mxu0 %v3551_v32  ;;  %v3641_v32 = vld [vmem:[%s4750_s1 + $0x608] ss:$16 sps:$4 sm:$0xff]  }
  0x94   :  { %1467 = vmatpush2.bf16.msra.mxu1 %v3548_v31  ;;  %1483 = vmatprep.subr.bf16.mxu0 %v3559_v34  ;;  %v3638_v31 = vld [vmem:[%s4750_s1 + $0x528] ss:$16 sps:$4 sm:$0xff]   ;;  %v3649_v34 = vld [vmem:[#allocation2 + $0xe4] ss:$16 sps:$4 sm:$0xff]  }
  0x95   :  { %1522 = vmatprep.subr.bf16.mxu1 %v3556_v33  ;;  %v3646_v33 = vld [vmem:[%s4750_s1 + $0x50c] ss:$16 sps:$4 sm:$0xff]  }
  0x97   :  { %1469 = vmatmul.mubr.bf16.vlgmr.msra.gmra.mxu1 %v4168_v12  ;;  %1484 = vmatpush1.bf16.msra.mxu0 %v3557_v36  ;;  %v3569_v12 = vld [vmem:[%s4750_s1 + $0x268] ss:$16 sps:$4 sm:$0xff]   ;;  %v3647_v36 = vld [vmem:[#allocation2 + $0xe0] ss:$16 sps:$4 sm:$0xff]  }
  0x98   :  { %1523 = vmatpush1.bf16.msra.mxu1 %v3554_v35  ;;  %1485 = vmatprep.subr.bf16.mxu0 %v3565_v38  ;;  %v3644_v35 = vld [vmem:[%s4750_s1 + $0x508] ss:$16 sps:$4 sm:$0xff]   ;;  %v3650_v38 = vld [vmem:[#allocation2 + $0xc0] ss:$16 sps:$4 sm:$0xff]  }
  0x99   :  { %1524 = vmatprep.subr.bf16.mxu1 %v3562_v37  ;;  %1554 = vmatprep.mubr.bf16.mxu1 %v4264_v44  ;;  %v3575_v44 = vld [vmem:[%s4750_s1 + $0x248] ss:$16 sps:$4 sm:$0xff]   ;;  %v3652_v37 = vld [vmem:[#allocation2 + $0xc4] ss:$16 sps:$4 sm:$0xff]  }
  0x9b   :  { %1486 = vmatpush1.bf16.msra.mxu0 %v3563_v54  ;;  %v3653_v54 = vld [vmem:[#allocation2 + $0xa0] ss:$16 sps:$4 sm:$0xff]  }
  0x9c   :  { %1525 = vmatpush1.bf16.msra.mxu1 %v3560_v39  ;;  %1487 = vmatprep.subr.bf16.mxu0 %v3571_v41  ;;  %v3655_v39 = vld [vmem:[#allocation2 + $0xa4] ss:$16 sps:$4 sm:$0xff]   ;;  %v3659_v41 = vld [vmem:[#allocation2 + $0x60] ss:$16 sps:$4 sm:$0xff]  }
  0x9d   :  { %1526 = vmatprep.subr.bf16.mxu1 %v3568_v40  ;;  %v3656_v40 = vld [vmem:[#allocation2 + $0x80] ss:$16 sps:$4 sm:$0xff]  }
  0x9f   :  { %1488 = vmatpush1.bf16.msra.mxu0 %v3569_v12  ;;  %v3703_v12 = vld [vmem:[#allocation2 + $0x2e4] ss:$16 sps:$4 sm:$0xff]  }
  0xa0   :  { %1527 = vmatpush1.bf16.msra.mxu1 %v3566_v42  ;;  %1489 = vmatprep.subr.bf16.mxu0 %v3577_v45  ;;  %v3701_v42 = vld [vmem:[#allocation2 + $0x2e0] ss:$16 sps:$4 sm:$0xff]   ;;  %v3709_v45 = vld [vmem:[#allocation2 + $0x2c4] ss:$16 sps:$4 sm:$0xff]  }
  0xa1   :  { %1528 = vmatprep.subr.bf16.mxu1 %v3574_v43  ;;  %v3707_v43 = vld [vmem:[#allocation2 + $0x2c0] ss:$16 sps:$4 sm:$0xff]  }
  0xa3   :  { %1490 = vmatpush1.bf16.msra.mxu0 %v3575_v44  ;;  %v3665_v44 = vld [vmem:[#allocation2 + $0x20] ss:$16 sps:$4 sm:$0xff]  }
  0xa4   :  { %1529 = vmatpush1.bf16.msra.mxu1 %v3572_v46  ;;  %1491 = vmatprep.subr.bf16.mxu0 %v3583_v48  ;;  %v3667_v46 = vld [vmem:[#allocation2 + $0x24] ss:$16 sps:$4 sm:$0xff]  }
  0xa5   :  { %1530 = vmatprep.subr.bf16.mxu1 %v3580_v47  ;;  %v3713_v47 = vld [vmem:[#allocation2 + $0x2a0] ss:$16 sps:$4 sm:$0xff]   ;;  %v3715_v48 = vld [vmem:[#allocation2 + $0x2a4] ss:$16 sps:$4 sm:$0xff]  }
  0xa7   :  { %1492 = vmatpush1.bf16.msra.mxu0 %v3581_v50  ;;  %v3668_v50 = vld [vmem:[#allocation2] ss:$16 sps:$4 sm:$0xff]  }
  0xa8   :  { %1531 = vmatpush1.bf16.msra.mxu1 %v3578_v49  ;;  %1493 = vmatprep.subr.bf16.mxu0 %v3589_v52  ;;  %v3670_v49 = vld [vmem:[#allocation2 + $0x4] ss:$16 sps:$4 sm:$0xff]  }
  0xa9   :  { %1532 = vmatprep.subr.bf16.mxu1 %v3586_v51  ;;  %v3719_v51 = vld [vmem:[#allocation2 + $0x280] ss:$16 sps:$4 sm:$0xff]   ;;  %v3721_v52 = vld [vmem:[#allocation2 + $0x284] ss:$16 sps:$4 sm:$0xff]  }
  0xab   :  { %1494 = vmatpush1.bf16.msra.mxu0 %v3587_v55  ;;  %v3671_v55 = vld [vmem:[#allocation2 + $0x1e0] ss:$16 sps:$4 sm:$0xff]  }
  0xac   :  { %1533 = vmatpush1.bf16.msra.mxu1 %v3584_v53  ;;  %1495 = vmatprep.subr.bf16.mxu0 %v3595_v57  ;;  %v3673_v53 = vld [vmem:[#allocation2 + $0x1e4] ss:$16 sps:$4 sm:$0xff]  }
  0xad   :  { %1534 = vmatprep.subr.bf16.mxu1 %v3592_v56  ;;  %v3725_v56 = vld [vmem:[#allocation2 + $0x260] ss:$16 sps:$4 sm:$0xff]   ;;  %v3727_v57 = vld [vmem:[#allocation2 + $0x264] ss:$16 sps:$4 sm:$0xff]  }
  0xaf   :  { %1496 = vmatpush2.bf16.msra.mxu0 %v3593_v59  ;;  %v3674_v59 = vld [vmem:[#allocation2 + $0x1c0] ss:$16 sps:$4 sm:$0xff]  }
  0xb0   :  { %1535 = vmatpush1.bf16.msra.mxu1 %v3590_v58  ;;  %1497 = vmatprep.subr.bf16.mxu0 %v3601_v61  ;;  %v3676_v58 = vld [vmem:[#allocation2 + $0x1c4] ss:$16 sps:$4 sm:$0xff]  }
  0xb1   :  { %1536 = vmatprep.subr.bf16.mxu1 %v3598_v60  ;;  %v3731_v60 = vld [vmem:[#allocation2 + $0x240] ss:$16 sps:$4 sm:$0xff]   ;;  %v3733_v61 = vld [vmem:[#allocation2 + $0x244] ss:$16 sps:$4 sm:$0xff]  }
  0xb3   :  { %1498 = vmatpush2.bf16.msra.mxu0 %v3599_v63  ;;  %v3677_v63 = vld [vmem:[#allocation2 + $0x1a0] ss:$16 sps:$4 sm:$0xff]  }
  0xb4   :  { %1537 = vmatpush1.bf16.msra.mxu1 %v3596_v62  ;;  %1499 = vmatprep.subr.bf16.mxu0 %v3607_v1  ;;  %v3679_v62 = vld [vmem:[#allocation2 + $0x1a4] ss:$16 sps:$4 sm:$0xff]  }
  0xb5   :  { %1538 = vmatprep.subr.bf16.mxu1 %v3604_v0  ;;  %v3737_v0 = vld [vmem:[#allocation2 + $0x220] ss:$16 sps:$4 sm:$0xff]   ;;  %v3739_v1 = vld [vmem:[#allocation2 + $0x224] ss:$16 sps:$4 sm:$0xff]  }
  0xb7   :  { %1500 = vmatpush2.bf16.msra.mxu0 %v3605_v3  ;;  %v3680_v3 = vld [vmem:[#allocation2 + $0x180] ss:$16 sps:$4 sm:$0xff]  }
  0xb8   :  { %1539 = vmatpush2.bf16.msra.mxu1 %v3602_v2  ;;  %1501 = vmatprep.subr.bf16.mxu0 %v3613_v5  ;;  %v3682_v2 = vld [vmem:[#allocation2 + $0x184] ss:$16 sps:$4 sm:$0xff]  }
  0xb9   :  { %1540 = vmatprep.subr.bf16.mxu1 %v3610_v4  ;;  %v3743_v4 = vld [vmem:[#allocation2 + $0x200] ss:$16 sps:$4 sm:$0xff]   ;;  %v3745_v5 = vld [vmem:[#allocation2 + $0x204] ss:$16 sps:$4 sm:$0xff]  }
  0xbb   :  { %1502 = vmatpush2.bf16.msra.mxu0 %v3611_v7  ;;  %v3683_v7 = vld [vmem:[#allocation2 + $0x160] ss:$16 sps:$4 sm:$0xff]  }
  0xbc   :  { %1541 = vmatpush2.bf16.msra.mxu1 %v3608_v6  ;;  %1503 = vmatprep.subr.bf16.mxu0 %v3619_v9  ;;  %v3685_v6 = vld [vmem:[#allocation2 + $0x164] ss:$16 sps:$4 sm:$0xff]  }
  0xbd   :  { %1542 = vmatprep.subr.bf16.mxu1 %v3616_v8  ;;  %v3749_v8 = vld [vmem:[#allocation2 + $0x3e0] ss:$16 sps:$4 sm:$0xff]   ;;  %v3751_v9 = vld [vmem:[#allocation2 + $0x3e4] ss:$16 sps:$4 sm:$0xff]  }
  0xbf   :  { %1504 = vmatpush2.bf16.msra.mxu0 %v3617_v11  ;;  %v3686_v11 = vld [vmem:[#allocation2 + $0x140] ss:$16 sps:$4 sm:$0xff]  }
  0xc0   :  { %1543 = vmatpush2.bf16.msra.mxu1 %v3614_v10  ;;  %1505 = vmatprep.subr.bf16.mxu0 %v3625_v15  ;;  %v3688_v10 = vld [vmem:[#allocation2 + $0x144] ss:$16 sps:$4 sm:$0xff]  }
  0xc1   :  { %1544 = vmatprep.subr.bf16.mxu1 %v3622_v14  ;;  %v3755_v14 = vld [vmem:[#allocation2 + $0x3c0] ss:$16 sps:$4 sm:$0xff]   ;;  %v3757_v15 = vld [vmem:[#allocation2 + $0x3c4] ss:$16 sps:$4 sm:$0xff]  }
  0xc3   :  { %1506 = vmatpush2.bf16.msra.mxu0 %v3623_v17  ;;  %v3689_v17 = vld [vmem:[#allocation2 + $0x120] ss:$16 sps:$4 sm:$0xff]  }
  0xc4   :  { %1545 = vmatpush2.bf16.msra.mxu1 %v3620_v16  ;;  %1507 = vmatprep.subr.bf16.mxu0 %v3631_v19  ;;  %v3691_v16 = vld [vmem:[#allocation2 + $0x124] ss:$16 sps:$4 sm:$0xff]  }
  0xc5   :  { %1546 = vmatprep.subr.bf16.mxu1 %v3628_v18  ;;  %v3761_v18 = vld [vmem:[#allocation2 + $0x3a0] ss:$16 sps:$4 sm:$0xff]   ;;  %v3763_v19 = vld [vmem:[#allocation2 + $0x3a4] ss:$16 sps:$4 sm:$0xff]  }
  0xc7   :  { %1508 = vmatpush2.bf16.msra.mxu0 %v3629_v22  ;;  %v3692_v22 = vld [vmem:[#allocation2 + $0x100] ss:$16 sps:$4 sm:$0xff]  }
  0xc8   :  { %1547 = vmatpush2.bf16.msra.mxu1 %v3626_v20  ;;  %1509 = vmatprep.subr.bf16.mxu0 %v3637_v25  ;;  %v3694_v20 = vld [vmem:[#allocation2 + $0x104] ss:$16 sps:$4 sm:$0xff]   ;;  %v3697_v25 = vld [vmem:[#allocation2 + $0xec] ss:$16 sps:$4 sm:$0xff]  }
  0xc9   :  { %1548 = vmatprep.subr.bf16.mxu1 %v3634_v24  ;;  %v3769_v24 = vld [vmem:[#allocation2 + $0x384] ss:$16 sps:$4 sm:$0xff]  }
  0xcb   :  { %1510 = vmatpush2.bf16.msra.mxu0 %v3635_v28  ;;  %v3775_v28 = vld [vmem:[#allocation2 + $0x364] ss:$16 sps:$4 sm:$0xff]  }
  0xcc   :  { %1549 = vmatpush2.bf16.msra.mxu1 %v3632_v27  ;;  %1579 = vmatprep.subr.bf16.mxu0 %v3643_v30  ;;  %v3767_v27 = vld [vmem:[#allocation2 + $0x380] ss:$16 sps:$4 sm:$0xff]   ;;  %v3781_v30 = vld [vmem:[#allocation2 + $0x344] ss:$16 sps:$4 sm:$0xff]  }
  0xcd   :  { %1550 = vmatprep.subr.bf16.mxu1 %v3640_v29  ;;  %v3773_v29 = vld [vmem:[#allocation2 + $0x360] ss:$16 sps:$4 sm:$0xff]  }
  0xce   :  { %1512 = vmatmul.mubr.bf16.vlgmr.msra.gmra.mxu0 %v4170_v13  ;;  %v3658_v13 = vld [vmem:[#allocation2 + $0x84] ss:$16 sps:$4 sm:$0xff]  }
  0xcf   :  { %1580 = vmatpush1.bf16.msra.mxu0 %v3641_v32  ;;  %1597 = vmatprep.mubr.bf16.mxu0 %v3896_v21  ;;  %v3661_v21 = vld [vmem:[#allocation2 + $0x64] ss:$16 sps:$4 sm:$0xff]  }
  0xd0   :  { %1551 = vmatpush2.bf16.msra.mxu1 %v3638_v31  ;;  %2410 = vmatprep.subr.bf16.mxu0 %v3649_v34  ;;  %v3779_v31 = vld [vmem:[#allocation2 + $0x340] ss:$16 sps:$4 sm:$0xff]   ;;  %v3787_v32 = vld [vmem:[#allocation2 + $0x324] ss:$16 sps:$4 sm:$0xff]  }
  0xd1   :  { %1552 = vmatprep.subr.bf16.mxu1 %v3646_v33  ;;  %v3785_v33 = vld [vmem:[#allocation2 + $0x320] ss:$16 sps:$4 sm:$0xff]   ;;  %v3790_v34 = vld [vmem:[#allocation2 + $0x304] ss:$16 sps:$4 sm:$0xff]  }
  0xd4   :  { %1553 = vmatpush2.bf16.msra.mxu1 %v3644_v35  ;;  %v3788_v35 = vld [vmem:[#allocation2 + $0x300] ss:$16 sps:$4 sm:$0xff]  }
  0xd5   :  { %2453 = vmatprep.subr.bf16.mxu1 %v3703_v12  ;;  %v4609_v12 = vld [vmem:[%s4751_s2] sm:$0xf] }
  0xd6   :  { %3143 = vmatmul.mubr.msk.bf16.vlgmr.msra.gmra.mxu0 %vm1260_vm0, %v4199_v23  ;;  %v3662_v23 = vld [vmem:[#allocation2 + $0x40] ss:$16 sps:$4 sm:$0xff]  }
  0xd7   :  { %1555 = vmatmul.mubr.bf16.vlgmr.msra.gmra.mxu1 %v4387_v26  ;;  %2411 = vmatpush1.bf16.msra.mxu0 %v3647_v36  ;;  %v3664_v26 = vld [vmem:[#allocation2 + $0x44] ss:$16 sps:$4 sm:$0xff]   ;;  %v3793_v36 = vld [vmem:[#allocation2 + $0x2ec] ss:$16 sps:$4 sm:$0xff]  }
  0xd8   :  { %2412 = vmatprep.subr.bf16.mxu0 %v3652_v37  ;;  %2454 = vmatpush1.bf16.msra.mxu1 %v3701_v42 }
  0xd9   :  { %2455 = vmatprep.subr.bf16.mxu1 %v3709_v45 }
  0xdb   :  { %2413 = vmatpush1.bf16.msra.mxu0 %v3650_v38  ;;  %v260_v38 = vlaneseq }
  0xdc   :  { %2414 = vmatprep.subr.bf16.mxu0 %v3655_v39  ;;  %2456 = vmatpush1.bf16.msra.mxu1 %v3707_v43 }
  0xdd   :  { %2457 = vmatprep.subr.bf16.mxu1 %v3715_v48 }
  0xdf   :  { %2415 = vmatpush1.bf16.msra.mxu0 %v3653_v54  ;;  %v4602_v54 = vshrl.u32 %v260_v38, 7  ;;  %v3752_v38 = vld [vmem:[#allocation2 + $0x1a8] ss:$16 sps:$4 sm:$0xff]  }
  0xe0   :  { %2416 = vmatprep.subr.bf16.mxu0 %v3658_v13  ;;  %2458 = vmatpush1.bf16.msra.mxu1 %v3713_v47 }
  0xe1   :  { %2459 = vmatprep.subr.bf16.mxu1 %v3721_v52 }
  0xe3   :  { %2417 = vmatpush1.bf16.msra.mxu0 %v3656_v40 }
  0xe4   :  { %2418 = vmatprep.subr.bf16.mxu0 %v3661_v21  ;;  %2460 = vmatpush1.bf16.msra.mxu1 %v3719_v51  ;;  %v266_v21 = vsub.s32 1, %v4602_v54 }
  0xe5   :  { %2461 = vmatprep.subr.bf16.mxu1 %v3727_v57 }
  0xe7   :  { %2419 = vmatpush1.bf16.msra.mxu0 %v3659_v41  ;;  %v262_v41 = vsub.s32 0, %v4602_v54 }
  0xe8   :  { %2420 = vmatprep.subr.bf16.mxu0 %v3664_v26  ;;  %2462 = vmatpush1.bf16.msra.mxu1 %v3725_v56 }
  0xe9   :  { %2463 = vmatprep.subr.bf16.mxu1 %v3733_v61  ;;  %v263_v43 = vrot.slane %v4609_v12, %v262_v41 }
  0xeb   :  { %2421 = vmatpush1.bf16.msra.mxu0 %v3662_v23  ;;  %v267_v23 = vrot.slane %v4609_v12, %v266_v21 }
  0xec   :  { %2422 = vmatprep.subr.bf16.mxu0 %v3667_v46  ;;  %2464 = vmatpush1.bf16.msra.mxu1 %v3731_v60 }
  0xed   :  { %2465 = vmatprep.subr.bf16.mxu1 %v3739_v1 }
  0xef   :  { %2423 = vmatpush1.bf16.msra.mxu0 %v3665_v44 }
  0xf0   :  { %2424 = vmatprep.subr.bf16.mxu0 %v3670_v49  ;;  %2466 = vmatpush1.bf16.msra.mxu1 %v3737_v0 }
  0xf1   :  { %2467 = vmatprep.subr.bf16.mxu1 %v3745_v5 }
  0xf3   :  { %2425 = vmatpush1.bf16.msra.mxu0 %v3668_v50 }
  0xf4   :  { %2426 = vmatprep.subr.bf16.mxu0 %v3673_v53  ;;  %2468 = vmatpush1.bf16.msra.mxu1 %v3743_v4 }
  0xf5   :  { %2469 = vmatprep.subr.bf16.mxu1 %v3751_v9 }
  0xf7   :  { %2427 = vmatpush2.bf16.msra.mxu0 %v3671_v55 }
  0xf8   :  { %2428 = vmatprep.subr.bf16.mxu0 %v3676_v58  ;;  %2470 = vmatpush2.bf16.msra.mxu1 %v3749_v8 }
  0xf9   :  { %2471 = vmatprep.subr.bf16.mxu1 %v3757_v15 }
  0xfb   :  { %2429 = vmatpush2.bf16.msra.mxu0 %v3674_v59 }
  0xfc   :  { %2430 = vmatprep.subr.bf16.mxu0 %v3679_v62  ;;  %2472 = vmatpush2.bf16.msra.mxu1 %v3755_v14  ;;  %v3695_v14 = vld [vmem:[#allocation2 + $0xe8] ss:$16 sps:$4 sm:$0xff]  }
  0xfd   :  { %2473 = vmatprep.subr.bf16.mxu1 %v3763_v19  ;;  %v3704_v19 = vld [vmem:[#allocation2 + $0xa8] ss:$16 sps:$4 sm:$0xff]  }
  0xff   :  { %2431 = vmatpush2.bf16.msra.mxu0 %v3677_v63 }
 0x100   :  { %2432 = vmatprep.subr.bf16.mxu0 %v3682_v2  ;;  %2474 = vmatpush2.bf16.msra.mxu1 %v3761_v18  ;;  %v3706_v18 = vld [vmem:[#allocation2 + $0xac] ss:$16 sps:$4 sm:$0xff]  }
 0x101   :  { %2475 = vmatprep.subr.bf16.mxu1 %v3769_v24  ;;  %v3718_v24 = vld [vmem:[#allocation2 + $0x6c] ss:$16 sps:$4 sm:$0xff]  }
 0x103   :  { %2433 = vmatpush2.bf16.msra.mxu0 %v3680_v3 }
 0x104   :  { %2434 = vmatprep.subr.bf16.mxu0 %v3685_v6  ;;  %2476 = vmatpush2.bf16.msra.mxu1 %v3767_v27  ;;  %v3724_v27 = vld [vmem:[#allocation2 + $0x4c] ss:$16 sps:$4 sm:$0xff]  }
 0x105   :  { %2477 = vmatprep.subr.bf16.mxu1 %v3775_v28  ;;  %v3722_v28 = vld [vmem:[#allocation2 + $0x48] ss:$16 sps:$4 sm:$0xff]  }
 0x107   :  { %2435 = vmatpush2.bf16.msra.mxu0 %v3683_v7 }
 0x108   :  { %2436 = vmatprep.subr.bf16.mxu0 %v3688_v10  ;;  %2478 = vmatpush2.bf16.msra.mxu1 %v3773_v29  ;;  %v3730_v29 = vld [vmem:[#allocation2 + $0x2c] ss:$16 sps:$4 sm:$0xff]  }
 0x109   :  { %2479 = vmatprep.subr.bf16.mxu1 %v3781_v30  ;;  %v3728_v30 = vld [vmem:[#allocation2 + $0x28] ss:$16 sps:$4 sm:$0xff]  }
 0x10b   :  { %2437 = vmatpush2.bf16.msra.mxu0 %v3686_v11 }
 0x10c   :  { %2438 = vmatprep.subr.bf16.mxu0 %v3691_v16  ;;  %2480 = vmatpush2.bf16.msra.mxu1 %v3779_v31  ;;  %v3700_v16 = vld [vmem:[#allocation2 + $0xcc] ss:$16 sps:$4 sm:$0xff]  }
 0x10d   :  { %2481 = vmatprep.subr.bf16.mxu1 %v3787_v32  ;;  %v3736_v31 = vld [vmem:[#allocation2 + $0xc] ss:$16 sps:$4 sm:$0xff]   ;;  %v3734_v32 = vld [vmem:[#allocation2 + $0x8] ss:$16 sps:$4 sm:$0xff]  }
 0x10e   :  { %v1298_v13 = vpop.f32.mrf.mxu0 }
 0x10f   :  { %2439 = vmatpush2.bf16.msra.mxu0 %v3689_v17  ;;  %v1341_v37 = vpop.f32.mrf.mxu1  ;;  %v1299_v47 = vadd.f32 %v1298_v13, %v263_v43  ;;  %v3698_v17 = vld [vmem:[#allocation2 + $0xc8] ss:$16 sps:$4 sm:$0xff]  }
 0x110   :  { %2440 = vmatprep.subr.bf16.mxu0 %v3694_v20  ;;  %2482 = vmatpush2.bf16.msra.mxu1 %v3785_v33  ;;  %v1300_v42 = vpop.f32.mrf.mxu0  ;;  %v3712_v20 = vld [vmem:[#allocation2 + $0x8c] ss:$16 sps:$4 sm:$0xff]   ;;  %v3758_v13 = vld [vmem:[#allocation2 + $0x188] ss:$16 sps:$4 sm:$0xff]  }
 0x111   :  { %2483 = vmatprep.subr.bf16.mxu1 %v3790_v34  ;;  %v1343_v39 = vpop.f32.mrf.mxu1  ;;  %v1301_v44 = vadd.f32 %v1300_v42, %v267_v23  ;;  %v1342_v55 = vadd.f32 %v1341_v37, %v1299_v47  ;;  %v3742_v33 = vld [vmem:[#allocation2 + $0x1ec] ss:$16 sps:$4 sm:$0xff]   ;;  %v3740_v34 = vld [vmem:[#allocation2 + $0x1e8] ss:$16 sps:$4 sm:$0xff]  }
 0x112   :  { %v1302_v45 = vpop.f32.mrf.mxu0  ;;  %v3754_v37 = vld [vmem:[#allocation2 + $0x1ac] ss:$16 sps:$4 sm:$0xff]   ;;  %v3770_v47 = vld [vmem:[#allocation2 + $0x148] ss:$16 sps:$4 sm:$0xff]  }
 0x113   :  { %2441 = vmatpush2.bf16.msra.mxu0 %v3692_v22  ;;  %v1345_v40 = vpop.f32.mrf.mxu1  ;;  %v1303_v49 = vadd.f32 %v1302_v45, %v263_v43  ;;  %v1344_v52 = vadd.f32 %v1343_v39, %v1301_v44  ;;  %v3710_v22 = vld [vmem:[#allocation2 + $0x88] ss:$16 sps:$4 sm:$0xff]   ;;  %v3760_v39 = vld [vmem:[#allocation2 + $0x18c] ss:$16 sps:$4 sm:$0xff]   ;;  %v274_v45 = vsub.s32 3, %v4602_v54 }
 0x114   :  { %2496 = vmatprep.subr.bf16.mxu0 %v3697_v25  ;;  %2484 = vmatpush2.bf16.msra.mxu1 %v3788_v35  ;;  %v1304_v48 = vpop.f32.mrf.mxu0  ;;  %v3716_v25 = vld [vmem:[#allocation2 + $0x68] ss:$16 sps:$4 sm:$0xff]   ;;  %v3748_v35 = vld [vmem:[#allocation2 + $0x1cc] ss:$16 sps:$4 sm:$0xff]  }
 0x115   :  { %2539 = vmatprep.subr.bf16.mxu1 %v3793_v36  ;;  %v1347_v26 = vpop.f32.mrf.mxu1  ;;  %v1305_v53 = vadd.f32 %v1304_v48, %v267_v23  ;;  %v1346_v57 = vadd.f32 %v1345_v40, %v1303_v49  ;;  %v3746_v36 = vld [vmem:[#allocation2 + $0x1c8] ss:$16 sps:$4 sm:$0xff]   ;;  %v3766_v42 = vld [vmem:[#allocation2 + $0x16c] ss:$16 sps:$4 sm:$0xff]  }
 0x116   :  { %v3772_v43 = vld [vmem:[#allocation2 + $0x14c] ss:$16 sps:$4 sm:$0xff]  }
 0x117   :  { %v1427_v46 = vpop.f32.mrf.mxu1  ;;  %v1348_v62 = vadd.f32 %v1347_v26, %v1305_v53  ;;  %v3764_v26 = vld [vmem:[#allocation2 + $0x168] ss:$16 sps:$4 sm:$0xff]  }
 0x119   :  { %v1429_v50 = vpop.f32.mrf.mxu1 }
 0x11b   :  { %v1431_v59 = vpop.f32.mrf.mxu1 }
 0x11d   :  { %v1433_v4 = vpop.f32.mrf.mxu1 }
 0x14e   :  { %v1384_v51 = vpop.f32.mrf.mxu0 }
 0x14f   :  { %v1385_v60 = vadd.f32 %v1384_v51, %v1342_v55  ;;  %v275_v51 = vrot.slane %v4609_v12, %v274_v45  ;;  %v3776_v55 = vld [vmem:[#allocation2 + $0x128] ss:$16 sps:$4 sm:$0xff]  }
 0x150   :  { %v1386_v56 = vpop.f32.mrf.mxu0 }
 0x151   :  { %v1387_v58 = vadd.f32 %v1386_v56, %v1344_v52  ;;  %v1428_v5 = vadd.f32 %v1427_v46, %v1385_v60  ;;  %v270_v46 = vsub.s32 2, %v4602_v54 }
 0x152   :  { %v1388_v61 = vpop.f32.mrf.mxu0 }
 0x153   :  { %v1389_v63 = vadd.f32 %v1388_v61, %v1346_v57  ;;  %v1430_v1 = vadd.f32 %v1429_v50, %v1387_v58  ;;  %v1608_v10 = vmax.f32 %v1428_v5, 0.0  ;;  %v3778_v50 = vld [vmem:[#allocation2 + $0x12c] ss:$16 sps:$4 sm:$0xff]   ;;  %v271_v52 = vrot.slane %v4609_v12, %v270_v46 }
 0x154   :  { %v1390_v0 = vpop.f32.mrf.mxu0  ;;  %v3784_v58 = vld [vmem:[#allocation2 + $0x10c] ss:$16 sps:$4 sm:$0xff]  }
 0x155   :  { %v1432_v2 = vadd.f32 %v1431_v59, %v1389_v63  ;;  %v1391_v3 = vadd.f32 %v1390_v0, %v1348_v62  ;;  %v1609_v8 = vmax.f32 %v1430_v1, 0.0  ;;  %v3782_v1 = vld [vmem:[#allocation2 + $0x108] ss:$16 sps:$4 sm:$0xff]  }
 0x157   :  { %v1434_v6 = vadd.f32 %v1433_v4, %v1391_v3  ;;  %v1612_v7 = vmax.f32 %v1432_v2, 0.0  ;;  %v1470_v40 = vpop.f32.mrf.mxu1 }
 0x158   :  { %v1471_v60 = vadd.f32 %v1470_v40, %v271_v52  ;;  %v3844_v40 = vld [vmem:[%s4754_s5 + $0x28] sm:$0xff]  }
 0x159   :  { %v1613_v9 = vmax.f32 %v1434_v6, 0.0  ;;  %v4617_v15 = vpack.c.bf16 %v1612_v7, %v1608_v10  ;;  %v1472_v23 = vpop.f32.mrf.mxu1 }
 0x15a   :  { %v1473_v59 = vadd.f32 %v1472_v23, %v275_v51  ;;  %v3803_v23 = vld [vmem:[#allocation2 + $0x268] ss:$16 sps:$4 sm:$0xff]  }
 0x15b   :  { %v1617_v11 = vpack.c.bf16 %v1613_v9, %v1609_v8  ;;  %v1474_v48 = vpop.f32.mrf.mxu1 }
 0x15c   :  { %v1475_v63 = vadd.f32 %v1474_v48, %v271_v52  ;;  %v3809_v48 = vld [vmem:[#allocation2 + $0x228] ss:$16 sps:$4 sm:$0xff]  }
 0x15d   :  { %2442 = vmatprep.mubr.bf16.mxu0 %v1617_v11  ;;  %v1476_v56 = vpop.f32.mrf.mxu1  ;;  %v3815_v52 = vld [vmem:[#allocation2 + $0x3e8] ss:$16 sps:$4 sm:$0xff]  }
 0x15e   :  { %2443 = vmatmul.mubr.bf16.vlgmr.msra.gmra.mxu0 %v4617_v15  ;;  %v1477_v12 = vadd.f32 %v1476_v56, %v275_v51  ;;  %v3817_v51 = vld [vmem:[#allocation2 + $0x3ec] ss:$16 sps:$4 sm:$0xff]  }
 0x15f   :  { %2497 = vmatpush1.bf16.msra.mxu0 %v3695_v14  ;;  %2528 = vmatprep.mubr.bf16.mxu0 %v1617_v11  ;;  %v3823_v56 = vld [vmem:[#allocation2 + $0x3ac] ss:$16 sps:$4 sm:$0xff]  }
 0x160   :  { %2498 = vmatprep.subr.bf16.mxu0 %v3700_v16 }
 0x163   :  { %2499 = vmatpush1.bf16.msra.mxu0 %v3698_v17 }
 0x164   :  { %2500 = vmatprep.subr.bf16.mxu0 %v3706_v18 }
 0x167   :  { %2501 = vmatpush1.bf16.msra.mxu0 %v3704_v19 }
 0x168   :  { %2502 = vmatprep.subr.bf16.mxu0 %v3712_v20 }
 0x16b   :  { %2503 = vmatpush1.bf16.msra.mxu0 %v3710_v22 }
 0x16c   :  { %2504 = vmatprep.subr.bf16.mxu0 %v3718_v24 }
 0x16f   :  { %2505 = vmatpush1.bf16.msra.mxu0 %v3716_v25 }
 0x170   :  { %2506 = vmatprep.subr.bf16.mxu0 %v3724_v27 }
 0x173   :  { %2507 = vmatpush1.bf16.msra.mxu0 %v3722_v28 }
 0x174   :  { %2508 = vmatprep.subr.bf16.mxu0 %v3730_v29 }
 0x177   :  { %2509 = vmatpush1.bf16.msra.mxu0 %v3728_v30  ;;  %v3791_v30 = vld [vmem:[#allocation2 + $0x2e8] ss:$16 sps:$4 sm:$0xff]  }
 0x178   :  { %2510 = vmatprep.subr.bf16.mxu0 %v3736_v31 }
 0x17b   :  { %2511 = vmatpush1.bf16.msra.mxu0 %v3734_v32  ;;  %v3796_v32 = vld [vmem:[#allocation2 + $0x2cc] ss:$16 sps:$4 sm:$0xff]  }
 0x17c   :  { %2512 = vmatprep.subr.bf16.mxu0 %v3742_v33  ;;  %v3839_v33 = vld [vmem:[%s4754_s5 + $0x78] sm:$0xff]  }
 0x17f   :  { %2513 = vmatpush2.bf16.msra.mxu0 %v3740_v34  ;;  %v3840_v34 = vld [vmem:[%s4754_s5 + $0x38] sm:$0xff]  }
 0x180   :  { %2514 = vmatprep.subr.bf16.mxu0 %v3748_v35  ;;  %v3794_v35 = vld [vmem:[#allocation2 + $0x2c8] ss:$16 sps:$4 sm:$0xff]  }
 0x183   :  { %2515 = vmatpush2.bf16.msra.mxu0 %v3746_v36  ;;  %v3799_v36 = vld [vmem:[#allocation2 + $0x2ac] ss:$16 sps:$4 sm:$0xff]  }
 0x184   :  { %2516 = vmatprep.subr.bf16.mxu0 %v3754_v37  ;;  %v3842_v37 = vld [vmem:[%s4754_s5 + $0x30] sm:$0xff]  }
 0x187   :  { %2517 = vmatpush2.bf16.msra.mxu0 %v3752_v38  ;;  %v3843_v38 = vld [vmem:[%s4754_s5 + $0x68] sm:$0xff]  }
 0x188   :  { %2518 = vmatprep.subr.bf16.mxu0 %v3760_v39  ;;  %v3797_v39 = vld [vmem:[#allocation2 + $0x2a8] ss:$16 sps:$4 sm:$0xff]  }
 0x18b   :  { %2519 = vmatpush2.bf16.msra.mxu0 %v3758_v13  ;;  %v3802_v13 = vld [vmem:[#allocation2 + $0x28c] ss:$16 sps:$4 sm:$0xff]  }
 0x18c   :  { %2520 = vmatprep.subr.bf16.mxu0 %v3766_v42  ;;  %v3800_v42 = vld [vmem:[#allocation2 + $0x288] ss:$16 sps:$4 sm:$0xff]  }
 0x18e   :  { %v1513_v44 = vpop.f32.mrf.mxu0 }
 0x18f   :  { %2521 = vmatpush2.bf16.msra.mxu0 %v3764_v26  ;;  %v1514_v2 = vadd.f32 %v1513_v44, %v1471_v60  ;;  %v3805_v26 = vld [vmem:[#allocation2 + $0x26c] ss:$16 sps:$4 sm:$0xff]   ;;  %v3806_v44 = vld [vmem:[#allocation2 + $0x248] ss:$16 sps:$4 sm:$0xff]  }
 0x190   :  { %v1515_v49 = vpop.f32.mrf.mxu0  ;;  %2522 = vmatprep.subr.bf16.mxu0 %v3772_v43  ;;  %v3808_v43 = vld [vmem:[#allocation2 + $0x24c] ss:$16 sps:$4 sm:$0xff]  }
 0x191   :  { %v1516_v0 = vadd.f32 %v1515_v49, %v1473_v59  ;;  %v3814_v49 = vld [vmem:[#allocation2 + $0x20c] ss:$16 sps:$4 sm:$0xff]   ;;  %v3824_v59 = vld [vmem:[#allocation2 + $0x388] ss:$16 sps:$4 sm:$0xff]  }
 0x192   :  { %v1517_v53 = vpop.f32.mrf.mxu0  ;;  %v3829_v60 = vld [vmem:[#allocation2 + $0x36c] ss:$16 sps:$4 sm:$0xff]  }
 0x193   :  { %2523 = vmatpush2.bf16.msra.mxu0 %v3770_v47  ;;  %v1518_v5 = vadd.f32 %v1517_v53, %v1475_v63  ;;  %v3811_v47 = vld [vmem:[#allocation2 + $0x22c] ss:$16 sps:$4 sm:$0xff]   ;;  %v3830_v63 = vld [vmem:[#allocation2 + $0x348] ss:$16 sps:$4 sm:$0xff]  }
 0x194   :  { %v1519_v57 = vpop.f32.mrf.mxu0  ;;  %2524 = vmatprep.subr.bf16.mxu0 %v3778_v50  ;;  %v3812_v50 = vld [vmem:[#allocation2 + $0x208] ss:$16 sps:$4 sm:$0xff]   ;;  %v3820_v53 = vld [vmem:[#allocation2 + $0x3cc] ss:$16 sps:$4 sm:$0xff]  }
 0x195   :  { %v1520_v10 = vadd.f32 %v1519_v57, %v1477_v12  ;;  %v3821_v57 = vld [vmem:[#allocation2 + $0x3a8] ss:$16 sps:$4 sm:$0xff]   ;;  %v3846_v12 = vld [vmem:[%s4754_s5 + $0x20] sm:$0xff]  }
 0x196   :  { %v1599_v62 = vpop.f32.mrf.mxu0 }
 0x197   :  { %v1556_v61 = vpop.f32.mrf.mxu1  ;;  %2525 = vmatpush2.bf16.msra.mxu0 %v3776_v55  ;;  %v3818_v55 = vld [vmem:[#allocation2 + $0x3c8] ss:$16 sps:$4 sm:$0xff]  }
 0x198   :  { %v1601_v4 = vpop.f32.mrf.mxu0  ;;  %2526 = vmatprep.subr.bf16.mxu0 %v3784_v58  ;;  %v1557_v7 = vadd.f32 %v1556_v61, %v1514_v2  ;;  %v3826_v58 = vld [vmem:[#allocation2 + $0x38c] ss:$16 sps:$4 sm:$0xff]   ;;  %v3827_v61 = vld [vmem:[#allocation2 + $0x368] ss:$16 sps:$4 sm:$0xff]  }
 0x199   :  { %v1558_v3 = vpop.f32.mrf.mxu1  ;;  %v3838_v2 = vld [vmem:[#allocation2 + $0x30c] ss:$16 sps:$4 sm:$0xff]  }
 0x19a   :  { %v1559_v6 = vadd.f32 %v1558_v3, %v1516_v0  ;;  %v1603_v9 = vpop.f32.mrf.mxu0  ;;  %v1600_v20 = vadd.f32 %v1599_v62, %v1557_v7  ;;  %v3832_v62 = vld [vmem:[#allocation2 + $0x34c] ss:$16 sps:$4 sm:$0xff]   ;;  %v3836_v3 = vld [vmem:[#allocation2 + $0x308] ss:$16 sps:$4 sm:$0xff]   ;;  %v3849_v7 = vld [vmem:[%s4754_s5 + $0x50] sm:$0xff]  }
 0x19b   :  { %v1560_v8 = vpop.f32.mrf.mxu1  ;;  %2527 = vmatpush2.bf16.msra.mxu0 %v3782_v1  ;;  %v3835_v0 = vld [vmem:[#allocation2 + $0x32c] ss:$16 sps:$4 sm:$0xff]   ;;  %v3833_v1 = vld [vmem:[#allocation2 + $0x328] ss:$16 sps:$4 sm:$0xff]  }
 0x19c   :  { %v1561_v11 = vadd.f32 %v1560_v8, %v1518_v5  ;;  %v1605_v16 = vpop.f32.mrf.mxu0  ;;  %v1602_v17 = vadd.f32 %v1601_v4, %v1559_v6  ;;  %v1610_v28 = vmax.f32 %v1600_v20, 0.0  ;;  %3305 = vmatprep.subr.bf16.mxu0 %v3839_v33  ;;  %v3845_v4 = vld [vmem:[%s4754_s5 + $0x60] sm:$0xff]   ;;  %v3847_v5 = vld [vmem:[%s4754_s5 + $0x58] sm:$0xff]   ;;  %v3850_v8 = vld [vmem:[%s4754_s5 + $0x10] sm:$0xff]  }
 0x19d   :  { %v1562_v14 = vpop.f32.mrf.mxu1  ;;  %v3848_v6 = vld [vmem:[%s4754_s5 + $0x18] sm:$0xff]   ;;  %v3859_v20 = vld [vmem:[%s4754_s5 + $0xe8] sm:$0xff]   ;;  %v3869_v33 = vld [vmem:[%s4754_s5 + $0xc0] sm:$0xff]  }
 0x19e   :  { %v1604_v18 = vadd.f32 %v1603_v9, %v1561_v11  ;;  %v1563_v19 = vadd.f32 %v1562_v14, %v1520_v10  ;;  %2529 = vmatmul.mubr.bf16.vlgmr.msra.gmra.mxu0 %v4617_v15  ;;  %v1611_v25 = vmax.f32 %v1602_v17, 0.0  ;;  %v3841_v15 = vld [vmem:[%s4754_s5 + $0x70] sm:$0xff]   ;;  %v3851_v9 = vld [vmem:[%s4754_s5 + $0x48] sm:$0xff]   ;;  %v3853_v11 = vld [vmem:[%s4754_s5 + $0x40] sm:$0xff]  }
 0x19f   :  { %3306 = vmatpush3.bf16.msra.mxu0 %v3840_v34  ;;  %v3852_v10 = vld [vmem:[%s4754_s5 + $0x8] sm:$0xff]   ;;  %v3854_v14 = vld [vmem:[%s4754_s5] sm:$0xff]   ;;  %v3856_v17 = vld [vmem:[%s4754_s5 + $0xb8] sm:$0xff]  }
 0x1a0   :  { %v1606_v22 = vadd.f32 %v1605_v16, %v1563_v19  ;;  %v1614_v24 = vmax.f32 %v1604_v18, 0.0  ;;  %3307 = vmatprep.subr.bf16.mxu0 %v3841_v15  ;;  %v3855_v16 = vld [vmem:[%s4754_s5 + $0xf8] sm:$0xff]   ;;  %v3857_v18 = vld [vmem:[%s4754_s5 + $0xf0] sm:$0xff]   ;;  %v3870_v34 = vld [vmem:[%s4754_s5 + $0x80] sm:$0xff]  }
 0x1a1   :  { %v3858_v19 = vld [vmem:[%s4754_s5 + $0xb0] sm:$0xff]  }
 0x1a2   :  { %v1615_v27 = vmax.f32 %v1606_v22, 0.0  ;;  %v4629_v31 = vpack.c.bf16 %v1614_v24, %v1610_v28  ;;  %v3860_v22 = vld [vmem:[%s4754_s5 + $0xa8] sm:$0xff]   ;;  %v3861_v24 = vld [vmem:[%s4754_s5 + $0xe0] sm:$0xff]   ;;  %v3864_v28 = vld [vmem:[%s4754_s5 + $0x98] sm:$0xff]  }
 0x1a3   :  { %3308 = vmatpush3.bf16.msra.mxu0 %v3842_v37 }
 0x1a4   :  { %v1619_v29 = vpack.c.bf16 %v1615_v27, %v1611_v25  ;;  %3309 = vmatprep.subr.bf16.mxu0 %v3843_v38  ;;  %v3862_v25 = vld [vmem:[%s4754_s5 + $0xa0] sm:$0xff]   ;;  %v3863_v27 = vld [vmem:[%s4754_s5 + $0xd8] sm:$0xff]  }
 0x1a6   :  { %2485 = vmatprep.mubr.bf16.mxu1 %v1619_v29 }
 0x1a7   :  { %2486 = vmatmul.mubr.bf16.vlgmr.msra.gmra.mxu1 %v4629_v31  ;;  %3310 = vmatpush3.bf16.msra.mxu0 %v3844_v40 }
 0x1a8   :  { %2540 = vmatpush1.bf16.msra.mxu1 %v3791_v30  ;;  %2571 = vmatprep.mubr.bf16.mxu1 %v1619_v29  ;;  %v3865_v29 = vld [vmem:[%s4754_s5 + $0xd0] sm:$0xff]  }
 0x1a9   :  { %2541 = vmatprep.subr.bf16.mxu1 %v3796_v32  ;;  %3311 = vmatprep.subr.bf16.mxu0 %v3845_v4  ;;  %v3866_v30 = vld [vmem:[%s4754_s5 + $0x90] sm:$0xff]   ;;  %v3868_v32 = vld [vmem:[%s4754_s5 + $0x88] sm:$0xff]  }
 0x1ab   :  { %3312 = vmatpush3.bf16.msra.mxu0 %v3846_v12 }
 0x1ac   :  { %2542 = vmatpush1.bf16.msra.mxu1 %v3794_v35  ;;  %3313 = vmatprep.subr.bf16.mxu0 %v3847_v5 }
 0x1ad   :  { %2543 = vmatprep.subr.bf16.mxu1 %v3799_v36  ;;  %v1748_v36 = vld [vmem:[%s4753_s4] sm:$0xf] }
 0x1ae   :  { %v1757_v38 = vrot.slane %v1748_v36, %v266_v21 }
 0x1af   :  { %3314 = vmatpush3.bf16.msra.mxu0 %v3848_v6 }
 0x1b0   :  { %2544 = vmatpush1.bf16.msra.mxu1 %v3797_v39  ;;  %3315 = vmatprep.subr.bf16.mxu0 %v3849_v7  ;;  %v1753_v39 = vrot.slane %v1748_v36, %v262_v41 }
 0x1b1   :  { %2545 = vmatprep.subr.bf16.mxu1 %v3802_v13 }
 0x1b3   :  { %3316 = vmatpush3.bf16.msra.mxu0 %v3850_v8 }
 0x1b4   :  { %2546 = vmatpush1.bf16.msra.mxu1 %v3800_v42  ;;  %3317 = vmatprep.subr.bf16.mxu0 %v3851_v9 }
 0x1b5   :  { %2547 = vmatprep.subr.bf16.mxu1 %v3805_v26 }
 0x1b7   :  { %3318 = vmatpush3.bf16.msra.mxu0 %v3852_v10 }
 0x1b8   :  { %2548 = vmatpush1.bf16.msra.mxu1 %v3803_v23  ;;  %3319 = vmatprep.subr.bf16.mxu0 %v3853_v11 }
 0x1b9   :  { %2549 = vmatprep.subr.bf16.mxu1 %v3808_v43 }
 0x1bb   :  { %3320 = vmatpush3.bf16.msra.mxu0 %v3854_v14 }
 0x1bc   :  { %2550 = vmatpush1.bf16.msra.mxu1 %v3806_v44 }
 0x1bd   :  { %2551 = vmatprep.subr.bf16.mxu1 %v3811_v47 }
 0x1c0   :  { %2552 = vmatpush1.bf16.msra.mxu1 %v3809_v48 }
 0x1c1   :  { %2553 = vmatprep.subr.bf16.mxu1 %v3814_v49 }
 0x1c4   :  { %2554 = vmatpush1.bf16.msra.mxu1 %v3812_v50 }
 0x1c5   :  { %2555 = vmatprep.subr.bf16.mxu1 %v3817_v51 }
 0x1c8   :  { %2556 = vmatpush2.bf16.msra.mxu1 %v3815_v52 }
 0x1c9   :  { %2557 = vmatprep.subr.bf16.mxu1 %v3820_v53 }
 0x1cc   :  { %2558 = vmatpush2.bf16.msra.mxu1 %v3818_v55 }
 0x1cd   :  { %2559 = vmatprep.subr.bf16.mxu1 %v3823_v56 }
 0x1d0   :  { %2560 = vmatpush2.bf16.msra.mxu1 %v3821_v57 }
 0x1d1   :  { %2561 = vmatprep.subr.bf16.mxu1 %v3826_v58 }
 0x1d4   :  { %2562 = vmatpush2.bf16.msra.mxu1 %v3824_v59 }
 0x1d5   :  { %2563 = vmatprep.subr.bf16.mxu1 %v3829_v60 }
 0x1d8   :  { %2564 = vmatpush2.bf16.msra.mxu1 %v3827_v61  ;;  %v1765_v61 = vrot.slane %v1748_v36, %v274_v45 }
 0x1d9   :  { %2565 = vmatprep.subr.bf16.mxu1 %v3832_v62  ;;  %v1761_v62 = vrot.slane %v1748_v36, %v270_v46 }
 0x1dc   :  { %2566 = vmatpush2.bf16.msra.mxu1 %v3830_v63 }
 0x1dd   :  { %2567 = vmatprep.subr.bf16.mxu1 %v3835_v0 }
 0x1e0   :  { %2568 = vmatpush2.bf16.msra.mxu1 %v3833_v1 }
 0x1e1   :  { %2569 = vmatprep.subr.bf16.mxu1 %v3838_v2 }
 0x1e4   :  { %2570 = vmatpush2.bf16.msra.mxu1 %v3836_v3 }
 0x1e5   :  { %3327 = vmatprep.subr.bf16.mxu1 %v3855_v16 }
 0x1e7   :  { %2572 = vmatmul.mubr.bf16.vlgmr.msra.gmra.mxu1 %v4629_v31  ;;  %v3867_v31 = vld [vmem:[%s4754_s5 + $0xc8] sm:$0xff]  }
 0x1e8   :  { %3328 = vmatpush3.bf16.msra.mxu1 %v3856_v17 }
 0x1e9   :  { %3329 = vmatprep.subr.bf16.mxu1 %v3857_v18 }
 0x1ec   :  { %3330 = vmatpush3.bf16.msra.mxu1 %v3858_v19 }
 0x1ed   :  { %3331 = vmatprep.subr.bf16.mxu1 %v3859_v20 }
 0x1f0   :  { %3332 = vmatpush3.bf16.msra.mxu1 %v3860_v22  ;;  %v3272_v22 = vld [vmem:[%s4755_s6] ss:$0 sm:$0xff] }
 0x1f1   :  { %3333 = vmatprep.subr.bf16.mxu1 %v3861_v24 }
 0x1f4   :  { %3334 = vmatpush3.bf16.msra.mxu1 %v3862_v25 }
 0x1f5   :  { %3335 = vmatprep.subr.bf16.mxu1 %v3863_v27 }
 0x1f8   :  { %3336 = vmatpush3.bf16.msra.mxu1 %v3864_v28 }
 0x1f9   :  { %3337 = vmatprep.subr.bf16.mxu1 %v3865_v29 }
 0x1fc   :  { %3338 = vmatpush3.bf16.msra.mxu1 %v3866_v30 }
 0x1fd   :  { %3339 = vmatprep.subr.bf16.mxu1 %v3867_v31 }
 0x200   :  { %3340 = vmatpush3.bf16.msra.mxu1 %v3868_v32 }
 0x201   :  { %3341 = vmatprep.subr.bf16.mxu1 %v3869_v33 }
 0x204   :  { %3342 = vmatpush3.bf16.msra.mxu1 %v3870_v34 }
 0x21e   :  { %v2444_v15 = vpop.f32.mrf.mxu0 }
 0x21f   :  { %v2445_v43 = vadd.f32 %v2444_v15, %v1753_v39 }
 0x220   :  { %v2446_v35 = vpop.f32.mrf.mxu0 }
 0x221   :  { %v2447_v26 = vadd.f32 %v2446_v35, %v1757_v38 }
 0x222   :  { %v2448_v37 = vpop.f32.mrf.mxu0 }
 0x223   :  { %v2449_v23 = vadd.f32 %v2448_v37, %v1753_v39 }
 0x224   :  { %v2450_v40 = vpop.f32.mrf.mxu0 }
 0x225   :  { %v2451_v47 = vadd.f32 %v2450_v40, %v1757_v38 }
 0x25e   :  { %v2530_v41 = vpop.f32.mrf.mxu0 }
 0x25f   :  { %v2531_v4 = vadd.f32 %v2530_v41, %v1761_v62 }
 0x260   :  { %v2532_v59 = vpop.f32.mrf.mxu0 }
 0x261   :  { %v2533_v2 = vadd.f32 %v2532_v59, %v1765_v61 }
 0x262   :  { %v2534_v60 = vpop.f32.mrf.mxu0 }
 0x263   :  { %v2535_v3 = vadd.f32 %v2534_v60, %v1761_v62 }
 0x264   :  { %v2536_v0 = vpop.f32.mrf.mxu0 }
 0x265   :  { %v2537_v5 = vadd.f32 %v2536_v0, %v1765_v61 }
 0x267   :  { %v2487_v13 = vpop.f32.mrf.mxu1 }
 0x268   :  { %v2488_v50 = vadd.f32 %v2487_v13, %v2445_v43 }
 0x269   :  { %v2489_v42 = vpop.f32.mrf.mxu1 }
 0x26a   :  { %v2490_v48 = vadd.f32 %v2489_v42, %v2447_v26  ;;  %v2582_v21 = vmax.f32 %v2488_v50, 0.0 }
 0x26b   :  { %v2491_v44 = vpop.f32.mrf.mxu1 }
 0x26c   :  { %v2492_v49 = vadd.f32 %v2491_v44, %v2449_v23  ;;  %v2583_v55 = vmax.f32 %v2490_v48, 0.0 }
 0x26d   :  { %v2493_v51 = vpop.f32.mrf.mxu1 }
 0x26e   :  { %v2494_v52 = vadd.f32 %v2493_v51, %v2451_v47  ;;  %v2586_v53 = vmax.f32 %v2492_v49, 0.0 }
 0x270   :  { %v2587_v56 = vmax.f32 %v2494_v52, 0.0  ;;  %v2590_v58 = vpack.c.bf16 %v2586_v53, %v2582_v21 }
 0x272   :  { %v2591_v57 = vpack.c.bf16 %v2587_v56, %v2583_v55 }
 0x274   :  { %2889 = vmatprep.mubr.bf16.mxu0 %v2591_v57 }
 0x275   :  { %2890 = vmatmul.mubr.bf16.vlgmr.msra.gmra.mxu0 %v2590_v58 }
 0x2a7   :  { %v2573_v63 = vpop.f32.mrf.mxu1 }
 0x2a8   :  { %v2574_v8 = vadd.f32 %v2573_v63, %v2531_v4 }
 0x2a9   :  { %v2575_v1 = vpop.f32.mrf.mxu1 }
 0x2aa   :  { %v2576_v6 = vadd.f32 %v2575_v1, %v2533_v2  ;;  %v2584_v45 = vmax.f32 %v2574_v8, 0.0 }
 0x2ab   :  { %v2577_v12 = vpop.f32.mrf.mxu1 }
 0x2ac   :  { %v2578_v7 = vadd.f32 %v2577_v12, %v2535_v3  ;;  %v2585_v14 = vmax.f32 %v2576_v6, 0.0 }
 0x2ad   :  { %v2579_v9 = vpop.f32.mrf.mxu1 }
 0x2ae   :  { %v2580_v10 = vadd.f32 %v2579_v9, %v2537_v5  ;;  %v2588_v11 = vmax.f32 %v2578_v7, 0.0 }
 0x2b0   :  { %v2589_v16 = vmax.f32 %v2580_v10, 0.0  ;;  %v2592_v54 = vpack.c.bf16 %v2588_v11, %v2584_v45 }
 0x2b2   :  { %v2593_v17 = vpack.c.bf16 %v2589_v16, %v2585_v14 }
 0x2b4   :  { %2930 = vmatprep.mubr.bf16.mxu1 %v2593_v17 }
 0x2b5   :  { %2931 = vmatmul.mubr.bf16.vlgmr.msra.gmra.mxu1 %v2592_v54 }
 0x335   :  { %v3321_v46 = vpop.f32.mrf.mxu0 }
 0x337   :  { %v3322_v18 = vpop.f32.mrf.mxu0 }
 0x338   :  { %v3323_v20 = vadd.f32 %v3322_v18, %v3321_v46 }
 0x339   :  { %v3324_v19 = vpop.f32.mrf.mxu0 }
 0x33a   :  { %v2892_v28 = vadd.f32 %v3323_v20, %v3272_v22 }
 0x33b   :  { %v3325_v24 = vpop.f32.mrf.mxu0 }
 0x33c   :  { %v3326_v29 = vadd.f32 %v3325_v24, %v3324_v19 }
 0x33e   :  { %v2895_v34 = vadd.f32 %v3326_v29, %v3272_v22 }
 0x375   :  { %v3343_v25 = vpop.f32.mrf.mxu1 }
 0x377   :  { %v3344_v27 = vpop.f32.mrf.mxu1 }
 0x378   :  { %v3345_v30 = vadd.f32 %v3344_v27, %v3343_v25 }
 0x379   :  { %v3346_v31 = vpop.f32.mrf.mxu1 }
 0x37a   :  { %v2933_v32 = vadd.f32 %v3345_v30, %v2892_v28 }
 0x37b   :  { %v3347_v33 = vpop.f32.mrf.mxu1 }
 0x37c   :  { %2939 = vst [vmem:[%s4756_s7] sm:$0xff] %v2933_v32  ;;  %v3348_v15 = vadd.f32 %v3347_v33, %v3346_v31 }
 0x37e   :  { %v2936_v35 = vadd.f32 %v3348_v15, %v2895_v34 }
 0x380   :  { %2940 = vst [vmem:[%s4756_s7 + $0x8] sm:$0xff] %v2936_v35 }
 0x381   :  { %2945 = vsyncpa [#allocation3], 1 }

</bundles_post_ra>
